<compile_context>
chip_gen: v7x
topology: tpu7x:2x2x1
jax: 0.10.0
libtpu: 0.0.40
codegen_flags: <defaults>
</compile_context>

<pallas_src>
import jax
import jax.numpy as jnp
from jax.experimental import pallas as pl
from jax.experimental.pallas import tpu as pltpu

KK = 4  # kernel_size fixed by the module defaults (stride=2, padding=1)

# For output phase p (= oh % 2): contributing kernel taps kh and input-row
# offsets dh (ih = a + dh, where oh = 2a + p), from oh = 2*ih - 1 + kh:
#   p=0: kh=1 -> dh= 0, kh=3 -> dh=-1
#   p=1: kh=0 -> dh=+1, kh=2 -> dh= 0
PHASE_TAPS = {0: ((1, 0), (3, -1)), 1: ((0, 1), (2, 0))}


def convt_relu_stats_kernel(x_ref, w_ref, b_ref, act_ref, sum_ref, sumsq_ref):
    """ConvTranspose2d(k=4,s=2,p=1) + bias + ReLU + per-batch channel stats.

    x_ref   : (H+2, W+2, Cin)      zero-padded input, one batch element (f32)
    w_ref   : (2, 2, 4*Cin, Cout)  per-phase fused weight (bf16)
    b_ref   : (1, Cout)            conv bias (f32)
    act_ref : (2, 2, H*W, Cout)    phased ReLU activations (bf16)
    sum_ref / sumsq_ref : (1, Cout) per-batch-element sum / sum-of-squares (f32)
    """
    Hp, Wp, Cin = x_ref.shape
    H, W = Hp - 2, Wp - 2
    HW, Cout = act_ref.shape[2], act_ref.shape[3]

    s_acc = jnp.zeros((1, Cout), jnp.float32)
    ss_acc = jnp.zeros((1, Cout), jnp.float32)
    for po in (0, 1):
        for pw in (0, 1):
            # Concatenate the 4 shifted input views along channels -> one
            # (H*W, 4*Cin) LHS => a single MXU matmul per phase (K = 4*Cin).
            parts = []
            for _, dh in PHASE_TAPS[po]:
                for _, dw in PHASE_TAPS[pw]:
                    parts.append(
                        x_ref[1 + dh:1 + dh + H, 1 + dw:1 + dw + W, :]
                        .reshape(HW, Cin))
            lhs = jnp.concatenate(parts, axis=-1).astype(w_ref.dtype)
            acc = jnp.dot(lhs, w_ref[po, pw],
                          preferred_element_type=jnp.float32)
            acc = jnp.maximum(acc + b_ref[...], 0.0)          # bias + ReLU
            act_ref[po, pw] = acc.astype(act_ref.dtype)       # contiguous store
            s_acc = s_acc + jnp.sum(acc, axis=0, keepdims=True)
            ss_acc = ss_acc + jnp.sum(acc * acc, axis=0, keepdims=True)
    sum_ref[...] = s_acc
    sumsq_ref[...] = ss_acc


def bn_interleave_kernel(act_ref, scale_ref, shift_ref, out_ref):
    """y = act*scale + shift, written directly in sub-pixel-interleaved layout.

    act_ref : (2, H*W, Cout)  phased activations for one (batch, row-phase)
    out_ref : (H, W, 2*Cout)  == out5[n, :, po, :, :]; lane index = pw*Cout + c
    """
    H, W, _ = out_ref.shape
    s = scale_ref[0, :]
    t = shift_ref[0, :]
    v0 = act_ref[0].astype(jnp.float32) * s + t     # column phase pw = 0
    v1 = act_ref[1].astype(jnp.float32) * s + t     # column phase pw = 1
    y = jnp.concatenate([v0, v1], axis=-1)          # (H*W, 2*Cout)
    out_ref[...] = y.reshape(H, W, y.shape[-1]).astype(out_ref.dtype)


def _fuse_weight(w, dtype):
    """(4, 4, Cin, Cout) -> (2, 2, 4*Cin, Cout); tap order matches the kernel."""
    rows = []
    for po in (0, 1):
        cols = []
        for pw in (0, 1):
            parts = [w[kh, kw]
                     for kh, _ in PHASE_TAPS[po]
                     for kw, _ in PHASE_TAPS[pw]]
            cols.append(jnp.concatenate(parts, axis=0))       # (4*Cin, Cout)
        rows.append(jnp.stack(cols, axis=0))
    return jnp.stack(rows, axis=0).astype(dtype)              # (2, 2, 4*Cin, Cout)


def trans_conv_block(x_nchw, w, b, gamma, beta, eps=1e-5,
                     mxu_dtype=jnp.bfloat16, act_dtype=jnp.bfloat16):
    """Forward pass of TransConvBlock.

    x_nchw : (N, Cin, H, W) float32
    w      : (4, 4, Cin, Cout) float32 -- PyTorch ConvTranspose2d weight
             (Cin, Cout, kh, kw) permuted to (kh, kw, Cin, Cout); NOT flipped
             (ConvTranspose indexing, unlike a Conv2d-style kernel).
    b, gamma, beta : (Cout,) float32  (conv bias, BatchNorm affine params)
    returns: (N, Cout, 2H, 2W) float32
    """
    N, Cin, H, W = x_nchw.shape
    assert w.shape[:3] == (KK, KK, Cin), (
        "w must be (4, 4, Cin, Cout): the torch ConvTranspose2d weight "
        "(Cin, Cout, kh, kw) transposed to (kh, kw, Cin, Cout), not flipped")
    Cout = w.shape[3]

    x = jnp.transpose(x_nchw, (0, 2, 3, 1)).astype(jnp.float32)    # NHWC
    xpad = jnp.pad(x, ((0, 0), (1, 1), (1, 1), (0, 0)))            # pad once
    w_fused = _fuse_weight(w.astype(jnp.float32), mxu_dtype)
    b2 = b.reshape(1, Cout).astype(jnp.float32)

    vmem = 32 * 1024 * 1024   # raise v5e's 16 MiB default scoped VMEM limit
    # TODO(synk): for large H add a spatial grid axis (N, H//tH) so the
    # double-buffered blocks stay within v7x's 64 MiB VMEM.

    act, psum, psumsq = pl.pallas_call(
        convt_relu_stats_kernel,
        out_shape=(
            jax.ShapeDtypeStruct((N, 2, 2, H * W, Cout), act_dtype),
            jax.ShapeDtypeStruct((N, 1, Cout), jnp.float32),
            jax.ShapeDtypeStruct((N, 1, Cout), jnp.float32),
        ),
        grid_spec=pltpu.PrefetchScalarGridSpec(
            num_scalar_prefetch=0,
            grid=(N,),
            in_specs=[
                pl.BlockSpec((None, H + 2, W + 2, Cin), lambda n: (n, 0, 0, 0)),
                pl.BlockSpec((2, 2, 4 * Cin, Cout), lambda n: (0, 0, 0, 0)),
                pl.BlockSpec((1, Cout), lambda n: (0, 0)),
            ],
            out_specs=(
                pl.BlockSpec((None, 2, 2, H * W, Cout),
                             lambda n: (n, 0, 0, 0, 0)),
                pl.BlockSpec((None, 1, Cout), lambda n: (n, 0, 0)),
                pl.BlockSpec((None, 1, Cout), lambda n: (n, 0, 0)),
            ),
        ),
        compiler_params=pltpu.CompilerParams(
            dimension_semantics=("parallel",),
            vmem_limit_bytes=vmem),
    )(xpad, w_fused, b2)

    # BatchNorm2d (training mode): biased batch statistics over (N, 2H, 2W).
    count = float(N * (2 * H) * (2 * W))
    mean = jnp.sum(psum, axis=(0, 1)) / count
    var = jnp.sum(psumsq, axis=(0, 1)) / count - mean * mean
    var = jnp.maximum(var, 0.0)                    # guard f32 cancellation
    scale = gamma.astype(jnp.float32) / jnp.sqrt(var + eps)
    shift = beta.astype(jnp.float32) - mean * scale
    # TODO(synk): running_mean / running_var buffer updates are training-time
    # side effects and are not part of the returned forward value.

    # Kernel 2: BN affine + sub-pixel interleave.  Output layout
    # (N, H, 2, W, 2*Cout) is bit-identical to NHWC (N, 2H, 2W, Cout): the row
    # phase is placed by the index_map, the column phase by the lane concat.
    out5 = pl.pallas_call(
        bn_interleave_kernel,
        out_shape=jax.ShapeDtypeStruct((N, H, 2, W, 2 * Cout), jnp.float32),
        grid_spec=pltpu.PrefetchScalarGridSpec(
            num_scalar_prefetch=0,
            grid=(N, 2),
            in_specs=[
                pl.BlockSpec((None, None, 2, H * W, Cout),
                             lambda n, po: (n, po, 0, 0, 0)),
                pl.BlockSpec((1, Cout), lambda n, po: (0, 0)),
                pl.BlockSpec((1, Cout), lambda n, po: (0, 0)),
            ],
            out_specs=pl.BlockSpec((None, H, None, W, 2 * Cout),
                                   lambda n, po: (n, 0, po, 0, 0)),
        ),
        compiler_params=pltpu.CompilerParams(
            dimension_semantics=("parallel", "parallel"),
            vmem_limit_bytes=vmem),
    )(act, scale.reshape(1, Cout), shift.reshape(1, Cout))

    y_nhwc = out5.reshape(N, 2 * H, 2 * W, Cout)   # pure reshape, no copy
    return jnp.transpose(y_nhwc, (0, 3, 1, 2))     # back to NCHW


def _reference_block(x, w, b, gamma, beta, eps=1e-5):
    """Pure-JAX reference (scatter form of ConvTranspose2d + ReLU + BN)."""
    N, Cin, H, W = x.shape
    Cout = w.shape[3]
    xs = jnp.transpose(x, (0, 2, 3, 1)).astype(jnp.float32)     # NHWC
    full = jnp.zeros((N, 2 * H + 2, 2 * W + 2, Cout), jnp.float32)
    for kh in range(KK):
        for kw in range(KK):
            contrib = jnp.einsum('nhwi,io->nhwo', xs, w[kh, kw])
            full = full.at[:, kh:kh + 2 * H:2, kw:kw + 2 * W:2, :].add(contrib)
    y = full[:, 1:1 + 2 * H, 1:1 + 2 * W, :] + b                # crop pad=1
    y = jnp.maximum(y, 0.0)
    mean = y.mean(axis=(0, 1, 2))
    var = ((y - mean) ** 2).mean(axis=(0, 1, 2))                # biased
    yn = (y - mean) / jnp.sqrt(var + eps) * gamma + beta
    return jnp.transpose(yn, (0, 3, 1, 2))


if __name__ == "__main__":
    key = jax.random.PRNGKey(0)
    N, Cin, Cout, H, W = 2, 4, 8, 8, 8

    k_x, k_w, k_b = jax.random.split(key, 3)
    x = jax.random.normal(k_x, (N, Cin, H, W), jnp.float32)

    # Deterministic parameter init (shapes from ConvTranspose2d(Cin, Cout, 4, 2, 1)
    # and BatchNorm2d(Cout)); uniform(-1/sqrt(fan), 1/sqrt(fan)) like PyTorch.
    fan = Cin * KK * KK
    bound = 1.0 / (fan ** 0.5)
    w = jax.random.uniform(k_w, (KK, KK, Cin, Cout), jnp.float32,
                           minval=-bound, maxval=bound)
    b = jax.random.uniform(k_b, (Cout,), jnp.float32,
                           minval=-bound, maxval=bound)
    gamma = jnp.ones((Cout,), jnp.float32)   # BatchNorm2d default weight
    beta = jnp.zeros((Cout,), jnp.float32)   # BatchNorm2d default bias

    fwd = jax.jit(trans_conv_block)
    y = fwd(x, w, b, gamma, beta)
    jax.block_until_ready(y)
    assert y.shape == (N, Cout, 2 * H, 2 * W), y.shape
    assert y.dtype == jnp.float32

    # Numerical sanity check vs pure-JAX reference (bf16 MXU tolerance).
    y_ref = _reference_block(x, w, b, gamma, beta)
    err = float(jnp.max(jnp.abs(y - y_ref)))
    assert err < 5e-2, f"max abs err {err}"
    print("KERNEL_OK")
</pallas_src>

<mosaic_0001>
module attributes {stable_mosaic.version = 11 : i64} {
  func.func @convt_relu_stats_kernel(%arg0: i32, %arg1: memref<1x10x10x4xf32, #tpu.memory_space<vmem>>, %arg2: memref<2x2x16x8xbf16, #tpu.memory_space<vmem>>, %arg3: memref<1x8xf32, #tpu.memory_space<vmem>>, %arg4: memref<1x2x2x64x8xbf16, #tpu.memory_space<vmem>>, %arg5: memref<1x1x8xf32, #tpu.memory_space<vmem>>, %arg6: memref<1x1x8xf32, #tpu.memory_space<vmem>>) attributes {dimension_semantics = [#tpu.dimension_semantics<parallel>], iteration_bounds = array<i64: 2>, scalar_prefetch = 0 : i64, scratch_operands = 0 : i64, tpu.core_type = #tpu.core_type<tc>, window_params = [{transform_indices = @transform_0, window_bounds = array<i64: 1, 10, 10, 4>}, {pipeline_mode = #tpu.pipeline_mode<synchronous>, transform_indices = @transform_1, window_bounds = array<i64: 2, 2, 16, 8>}, {pipeline_mode = #tpu.pipeline_mode<synchronous>, transform_indices = @transform_2, window_bounds = array<i64: 1, 8>}, {transform_indices = @transform_3, window_bounds = array<i64: 1, 2, 2, 64, 8>}, {transform_indices = @transform_4, window_bounds = array<i64: 1, 1, 8>}, {transform_indices = @transform_5, window_bounds = array<i64: 1, 1, 8>}]} {
    %cst = arith.constant 0.000000e+00 : f32
    %0 = vector.broadcast %cst : f32 to vector<1x8xf32>
    %cst_0 = arith.constant 0.000000e+00 : f32
    %1 = vector.broadcast %cst_0 : f32 to vector<1x8xf32>
    %c0 = arith.constant 0 : index
    %c1 = arith.constant 1 : index
    %c1_1 = arith.constant 1 : index
    %c0_2 = arith.constant 0 : index
    %2 = vector.load %arg1[%c0, %c1, %c1_1, %c0_2] : memref<1x10x10x4xf32, #tpu.memory_space<vmem>>, vector<1x8x8x4xf32>
    %3 = vector.shape_cast %2 : vector<1x8x8x4xf32> to vector<8x8x4xf32>
    %4 = vector.shape_cast %3 : vector<8x8x4xf32> to vector<64x4xf32>
    %c0_3 = arith.constant 0 : index
    %c1_4 = arith.constant 1 : index
    %c0_5 = arith.constant 0 : index
    %c0_6 = arith.constant 0 : index
    %5 = vector.load %arg1[%c0_3, %c1_4, %c0_5, %c0_6] : memref<1x10x10x4xf32, #tpu.memory_space<vmem>>, vector<1x8x8x4xf32>
    %6 = vector.shape_cast %5 : vector<1x8x8x4xf32> to vector<8x8x4xf32>
    %7 = vector.shape_cast %6 : vector<8x8x4xf32> to vector<64x4xf32>
    %c0_7 = arith.constant 0 : index
    %c0_8 = arith.constant 0 : index
    %c1_9 = arith.constant 1 : index
    %c0_10 = arith.constant 0 : index
    %8 = vector.load %arg1[%c0_7, %c0_8, %c1_9, %c0_10] : memref<1x10x10x4xf32, #tpu.memory_space<vmem>>, vector<1x8x8x4xf32>
    %9 = vector.shape_cast %8 : vector<1x8x8x4xf32> to vector<8x8x4xf32>
    %10 = vector.shape_cast %9 : vector<8x8x4xf32> to vector<64x4xf32>
    %c0_11 = arith.constant 0 : index
    %c0_12 = arith.constant 0 : index
    %c0_13 = arith.constant 0 : index
    %c0_14 = arith.constant 0 : index
    %11 = vector.load %arg1[%c0_11, %c0_12, %c0_13, %c0_14] : memref<1x10x10x4xf32, #tpu.memory_space<vmem>>, vector<1x8x8x4xf32>
    %12 = vector.shape_cast %11 : vector<1x8x8x4xf32> to vector<8x8x4xf32>
    %13 = vector.shape_cast %12 : vector<8x8x4xf32> to vector<64x4xf32>
    %14 = tpu.concatenate %4, %7, %10, %13 in 1 : vector<64x4xf32>, vector<64x4xf32>, vector<64x4xf32>, vector<64x4xf32> -> vector<64x16xf32>
    %15 = arith.truncf %14 : vector<64x16xf32> to vector<64x16xbf16>
    %c0_15 = arith.constant 0 : index
    %c0_16 = arith.constant 0 : index
    %c0_17 = arith.constant 0 : index
    %c0_18 = arith.constant 0 : index
    %16 = vector.load %arg2[%c0_15, %c0_16, %c0_17, %c0_18] : memref<2x2x16x8xbf16, #tpu.memory_space<vmem>>, vector<1x1x16x8xbf16>
    %17 = vector.shape_cast %16 : vector<1x1x16x8xbf16> to vector<16x8xbf16>
    %cst_19 = arith.constant dense<0.000000e+00> : vector<64x8xf32>
    %18 = tpu.matmul %15, %17, %cst_19 {dimension_numbers = #tpu.dot_dimension_numbers<[1], [0], [0], [1], [0, 0, 1, 1], [], []>} : vector<64x16xbf16>, vector<16x8xbf16>, vector<64x8xf32> -> vector<64x8xf32>
    %c0_20 = arith.constant 0 : index
    %c0_21 = arith.constant 0 : index
    %19 = vector.load %arg3[%c0_20, %c0_21] : memref<1x8xf32, #tpu.memory_space<vmem>>, vector<1x8xf32>
    %20 = vector.broadcast %19 : vector<1x8xf32> to vector<64x8xf32>
    %21 = arith.addf %18, %20 : vector<64x8xf32>
    %cst_22 = arith.constant 0.000000e+00 : f32
    %22 = vector.broadcast %cst_22 : f32 to vector<64x8xf32>
    %23 = arith.maximumf %21, %22 : vector<64x8xf32>
    %24 = arith.truncf %23 : vector<64x8xf32> to vector<64x8xbf16>
    %c0_23 = arith.constant 0 : index
    %c0_24 = arith.constant 0 : index
    %c0_25 = arith.constant 0 : index
    %c0_26 = arith.constant 0 : index
    %c0_27 = arith.constant 0 : index
    %25 = vector.load %arg4[%c0_23, %c0_24, %c0_25, %c0_26, %c0_27] : memref<1x2x2x64x8xbf16, #tpu.memory_space<vmem>>, vector<1x1x1x64x8xbf16>
    %26 = vector.shape_cast %25 : vector<1x1x1x64x8xbf16> to vector<64x8xbf16>
    %27 = vector.shape_cast %24 : vector<64x8xbf16> to vector<1x1x1x64x8xbf16>
    tpu.vector_store %arg4[%c0_23, %c0_24, %c0_25, %c0_26, %c0_27], %27 {strides = array<i32>} : memref<1x2x2x64x8xbf16, #tpu.memory_space<vmem>>, vector<1x1x1x64x8xbf16>,
    %cst_28 = arith.constant dense<0.000000e+00> : vector<8xf32>
    %28 = vector.multi_reduction <add>, %23, %cst_28 [0] : vector<64x8xf32> to vector<8xf32>
    %29 = vector.shape_cast %28 : vector<8xf32> to vector<1x8xf32>
    %30 = arith.addf %0, %29 : vector<1x8xf32>
    %31 = arith.mulf %23, %23 : vector<64x8xf32>
    %cst_29 = arith.constant dense<0.000000e+00> : vector<8xf32>
    %32 = vector.multi_reduction <add>, %31, %cst_29 [0] : vector<64x8xf32> to vector<8xf32>
    %33 = vector.shape_cast %32 : vector<8xf32> to vector<1x8xf32>
    %34 = arith.addf %1, %33 : vector<1x8xf32>
    %c0_30 = arith.constant 0 : index
    %c1_31 = arith.constant 1 : index
    %c2 = arith.constant 2 : index
    %c0_32 = arith.constant 0 : index
    %35 = vector.load %arg1[%c0_30, %c1_31, %c2, %c0_32] : memref<1x10x10x4xf32, #tpu.memory_space<vmem>>, vector<1x8x8x4xf32>
    %36 = vector.shape_cast %35 : vector<1x8x8x4xf32> to vector<8x8x4xf32>
    %37 = vector.shape_cast %36 : vector<8x8x4xf32> to vector<64x4xf32>
    %c0_33 = arith.constant 0 : index
    %c1_34 = arith.constant 1 : index
    %c1_35 = arith.constant 1 : index
    %c0_36 = arith.constant 0 : index
    %38 = vector.load %arg1[%c0_33, %c1_34, %c1_35, %c0_36] : memref<1x10x10x4xf32, #tpu.memory_space<vmem>>, vector<1x8x8x4xf32>
    %39 = vector.shape_cast %38 : vector<1x8x8x4xf32> to vector<8x8x4xf32>
    %40 = vector.shape_cast %39 : vector<8x8x4xf32> to vector<64x4xf32>
    %c0_37 = arith.constant 0 : index
    %c0_38 = arith.constant 0 : index
    %c2_39 = arith.constant 2 : index
    %c0_40 = arith.constant 0 : index
    %41 = vector.load %arg1[%c0_37, %c0_38, %c2_39, %c0_40] : memref<1x10x10x4xf32, #tpu.memory_space<vmem>>, vector<1x8x8x4xf32>
    %42 = vector.shape_cast %41 : vector<1x8x8x4xf32> to vector<8x8x4xf32>
    %43 = vector.shape_cast %42 : vector<8x8x4xf32> to vector<64x4xf32>
    %c0_41 = arith.constant 0 : index
    %c0_42 = arith.constant 0 : index
    %c1_43 = arith.constant 1 : index
    %c0_44 = arith.constant 0 : index
    %44 = vector.load %arg1[%c0_41, %c0_42, %c1_43, %c0_44] : memref<1x10x10x4xf32, #tpu.memory_space<vmem>>, vector<1x8x8x4xf32>
    %45 = vector.shape_cast %44 : vector<1x8x8x4xf32> to vector<8x8x4xf32>
    %46 = vector.shape_cast %45 : vector<8x8x4xf32> to vector<64x4xf32>
    %47 = tpu.concatenate %37, %40, %43, %46 in 1 : vector<64x4xf32>, vector<64x4xf32>, vector<64x4xf32>, vector<64x4xf32> -> vector<64x16xf32>
    %48 = arith.truncf %47 : vector<64x16xf32> to vector<64x16xbf16>
    %c0_45 = arith.constant 0 : index
    %c1_46 = arith.constant 1 : index
    %c0_47 = arith.constant 0 : index
    %c0_48 = arith.constant 0 : index
    %49 = vector.load %arg2[%c0_45, %c1_46, %c0_47, %c0_48] : memref<2x2x16x8xbf16, #tpu.memory_space<vmem>>, vector<1x1x16x8xbf16>
    %50 = vector.shape_cast %49 : vector<1x1x16x8xbf16> to vector<16x8xbf16>
    %cst_49 = arith.constant dense<0.000000e+00> : vector<64x8xf32>
    %51 = tpu.matmul %48, %50, %cst_49 {dimension_numbers = #tpu.dot_dimension_numbers<[1], [0], [0], [1], [0, 0, 1, 1], [], []>} : vector<64x16xbf16>, vector<16x8xbf16>, vector<64x8xf32> -> vector<64x8xf32>
    %c0_50 = arith.constant 0 : index
    %c0_51 = arith.constant 0 : index
    %52 = vector.load %arg3[%c0_50, %c0_51] : memref<1x8xf32, #tpu.memory_space<vmem>>, vector<1x8xf32>
    %53 = vector.broadcast %52 : vector<1x8xf32> to vector<64x8xf32>
    %54 = arith.addf %51, %53 : vector<64x8xf32>
    %cst_52 = arith.constant 0.000000e+00 : f32
    %55 = vector.broadcast %cst_52 : f32 to vector<64x8xf32>
    %56 = arith.maximumf %54, %55 : vector<64x8xf32>
    %57 = arith.truncf %56 : vector<64x8xf32> to vector<64x8xbf16>
    %c0_53 = arith.constant 0 : index
    %c0_54 = arith.constant 0 : index
    %c1_55 = arith.constant 1 : index
    %c0_56 = arith.constant 0 : index
    %c0_57 = arith.constant 0 : index
    %58 = vector.load %arg4[%c0_53, %c0_54, %c1_55, %c0_56, %c0_57] : memref<1x2x2x64x8xbf16, #tpu.memory_space<vmem>>, vector<1x1x1x64x8xbf16>
    %59 = vector.shape_cast %58 : vector<1x1x1x64x8xbf16> to vector<64x8xbf16>
    %60 = vector.shape_cast %57 : vector<64x8xbf16> to vector<1x1x1x64x8xbf16>
    tpu.vector_store %arg4[%c0_53, %c0_54, %c1_55, %c0_56, %c0_57], %60 {strides = array<i32>} : memref<1x2x2x64x8xbf16, #tpu.memory_space<vmem>>, vector<1x1x1x64x8xbf16>,
    %cst_58 = arith.constant dense<0.000000e+00> : vector<8xf32>
    %61 = vector.multi_reduction <add>, %56, %cst_58 [0] : vector<64x8xf32> to vector<8xf32>
    %62 = vector.shape_cast %61 : vector<8xf32> to vector<1x8xf32>
    %63 = arith.addf %30, %62 : vector<1x8xf32>
    %64 = arith.mulf %56, %56 : vector<64x8xf32>
    %cst_59 = arith.constant dense<0.000000e+00> : vector<8xf32>
    %65 = vector.multi_reduction <add>, %64, %cst_59 [0] : vector<64x8xf32> to vector<8xf32>
    %66 = vector.shape_cast %65 : vector<8xf32> to vector<1x8xf32>
    %67 = arith.addf %34, %66 : vector<1x8xf32>
    %c0_60 = arith.constant 0 : index
    %c2_61 = arith.constant 2 : index
    %c1_62 = arith.constant 1 : index
    %c0_63 = arith.constant 0 : index
    %68 = vector.load %arg1[%c0_60, %c2_61, %c1_62, %c0_63] : memref<1x10x10x4xf32, #tpu.memory_space<vmem>>, vector<1x8x8x4xf32>
    %69 = vector.shape_cast %68 : vector<1x8x8x4xf32> to vector<8x8x4xf32>
    %70 = vector.shape_cast %69 : vector<8x8x4xf32> to vector<64x4xf32>
    %c0_64 = arith.constant 0 : index
    %c2_65 = arith.constant 2 : index
    %c0_66 = arith.constant 0 : index
    %c0_67 = arith.constant 0 : index
    %71 = vector.load %arg1[%c0_64, %c2_65, %c0_66, %c0_67] : memref<1x10x10x4xf32, #tpu.memory_space<vmem>>, vector<1x8x8x4xf32>
    %72 = vector.shape_cast %71 : vector<1x8x8x4xf32> to vector<8x8x4xf32>
    %73 = vector.shape_cast %72 : vector<8x8x4xf32> to vector<64x4xf32>
    %c0_68 = arith.constant 0 : index
    %c1_69 = arith.constant 1 : index
    %c1_70 = arith.constant 1 : index
    %c0_71 = arith.constant 0 : index
    %74 = vector.load %arg1[%c0_68, %c1_69, %c1_70, %c0_71] : memref<1x10x10x4xf32, #tpu.memory_space<vmem>>, vector<1x8x8x4xf32>
    %75 = vector.shape_cast %74 : vector<1x8x8x4xf32> to vector<8x8x4xf32>
    %76 = vector.shape_cast %75 : vector<8x8x4xf32> to vector<64x4xf32>
    %c0_72 = arith.constant 0 : index
    %c1_73 = arith.constant 1 : index
    %c0_74 = arith.constant 0 : index
    %c0_75 = arith.constant 0 : index
    %77 = vector.load %arg1[%c0_72, %c1_73, %c0_74, %c0_75] : memref<1x10x10x4xf32, #tpu.memory_space<vmem>>, vector<1x8x8x4xf32>
    %78 = vector.shape_cast %77 : vector<1x8x8x4xf32> to vector<8x8x4xf32>
    %79 = vector.shape_cast %78 : vector<8x8x4xf32> to vector<64x4xf32>
    %80 = tpu.concatenate %70, %73, %76, %79 in 1 : vector<64x4xf32>, vector<64x4xf32>, vector<64x4xf32>, vector<64x4xf32> -> vector<64x16xf32>
    %81 = arith.truncf %80 : vector<64x16xf32> to vector<64x16xbf16>
    %c1_76 = arith.constant 1 : index
    %c0_77 = arith.constant 0 : index
    %c0_78 = arith.constant 0 : index
    %c0_79 = arith.constant 0 : index
    %82 = vector.load %arg2[%c1_76, %c0_77, %c0_78, %c0_79] : memref<2x2x16x8xbf16, #tpu.memory_space<vmem>>, vector<1x1x16x8xbf16>
    %83 = vector.shape_cast %82 : vector<1x1x16x8xbf16> to vector<16x8xbf16>
    %cst_80 = arith.constant dense<0.000000e+00> : vector<64x8xf32>
    %84 = tpu.matmul %81, %83, %cst_80 {dimension_numbers = #tpu.dot_dimension_numbers<[1], [0], [0], [1], [0, 0, 1, 1], [], []>} : vector<64x16xbf16>, vector<16x8xbf16>, vector<64x8xf32> -> vector<64x8xf32>
    %c0_81 = arith.constant 0 : index
    %c0_82 = arith.constant 0 : index
    %85 = vector.load %arg3[%c0_81, %c0_82] : memref<1x8xf32, #tpu.memory_space<vmem>>, vector<1x8xf32>
    %86 = vector.broadcast %85 : vector<1x8xf32> to vector<64x8xf32>
    %87 = arith.addf %84, %86 : vector<64x8xf32>
    %cst_83 = arith.constant 0.000000e+00 : f32
    %88 = vector.broadcast %cst_83 : f32 to vector<64x8xf32>
    %89 = arith.maximumf %87, %88 : vector<64x8xf32>
    %90 = arith.truncf %89 : vector<64x8xf32> to vector<64x8xbf16>
    %c0_84 = arith.constant 0 : index
    %c1_85 = arith.constant 1 : index
    %c0_86 = arith.constant 0 : index
    %c0_87 = arith.constant 0 : index
    %c0_88 = arith.constant 0 : index
    %91 = vector.load %arg4[%c0_84, %c1_85, %c0_86, %c0_87, %c0_88] : memref<1x2x2x64x8xbf16, #tpu.memory_space<vmem>>, vector<1x1x1x64x8xbf16>
    %92 = vector.shape_cast %91 : vector<1x1x1x64x8xbf16> to vector<64x8xbf16>
    %93 = vector.shape_cast %90 : vector<64x8xbf16> to vector<1x1x1x64x8xbf16>
    tpu.vector_store %arg4[%c0_84, %c1_85, %c0_86, %c0_87, %c0_88], %93 {strides = array<i32>} : memref<1x2x2x64x8xbf16, #tpu.memory_space<vmem>>, vector<1x1x1x64x8xbf16>,
    %cst_89 = arith.constant dense<0.000000e+00> : vector<8xf32>
    %94 = vector.multi_reduction <add>, %89, %cst_89 [0] : vector<64x8xf32> to vector<8xf32>
    %95 = vector.shape_cast %94 : vector<8xf32> to vector<1x8xf32>
    %96 = arith.addf %63, %95 : vector<1x8xf32>
    %97 = arith.mulf %89, %89 : vector<64x8xf32>
    %cst_90 = arith.constant dense<0.000000e+00> : vector<8xf32>
    %98 = vector.multi_reduction <add>, %97, %cst_90 [0] : vector<64x8xf32> to vector<8xf32>
    %99 = vector.shape_cast %98 : vector<8xf32> to vector<1x8xf32>
    %100 = arith.addf %67, %99 : vector<1x8xf32>
    %c0_91 = arith.constant 0 : index
    %c2_92 = arith.constant 2 : index
    %c2_93 = arith.constant 2 : index
    %c0_94 = arith.constant 0 : index
    %101 = vector.load %arg1[%c0_91, %c2_92, %c2_93, %c0_94] : memref<1x10x10x4xf32, #tpu.memory_space<vmem>>, vector<1x8x8x4xf32>
    %102 = vector.shape_cast %101 : vector<1x8x8x4xf32> to vector<8x8x4xf32>
    %103 = vector.shape_cast %102 : vector<8x8x4xf32> to vector<64x4xf32>
    %c0_95 = arith.constant 0 : index
    %c2_96 = arith.constant 2 : index
    %c1_97 = arith.constant 1 : index
    %c0_98 = arith.constant 0 : index
    %104 = vector.load %arg1[%c0_95, %c2_96, %c1_97, %c0_98] : memref<1x10x10x4xf32, #tpu.memory_space<vmem>>, vector<1x8x8x4xf32>
    %105 = vector.shape_cast %104 : vector<1x8x8x4xf32> to vector<8x8x4xf32>
    %106 = vector.shape_cast %105 : vector<8x8x4xf32> to vector<64x4xf32>
    %c0_99 = arith.constant 0 : index
    %c1_100 = arith.constant 1 : index
    %c2_101 = arith.constant 2 : index
    %c0_102 = arith.constant 0 : index
    %107 = vector.load %arg1[%c0_99, %c1_100, %c2_101, %c0_102] : memref<1x10x10x4xf32, #tpu.memory_space<vmem>>, vector<1x8x8x4xf32>
    %108 = vector.shape_cast %107 : vector<1x8x8x4xf32> to vector<8x8x4xf32>
    %109 = vector.shape_cast %108 : vector<8x8x4xf32> to vector<64x4xf32>
    %c0_103 = arith.constant 0 : index
    %c1_104 = arith.constant 1 : index
    %c1_105 = arith.constant 1 : index
    %c0_106 = arith.constant 0 : index
    %110 = vector.load %arg1[%c0_103, %c1_104, %c1_105, %c0_106] : memref<1x10x10x4xf32, #tpu.memory_space<vmem>>, vector<1x8x8x4xf32>
    %111 = vector.shape_cast %110 : vector<1x8x8x4xf32> to vector<8x8x4xf32>
    %112 = vector.shape_cast %111 : vector<8x8x4xf32> to vector<64x4xf32>
    %113 = tpu.concatenate %103, %106, %109, %112 in 1 : vector<64x4xf32>, vector<64x4xf32>, vector<64x4xf32>, vector<64x4xf32> -> vector<64x16xf32>
    %114 = arith.truncf %113 : vector<64x16xf32> to vector<64x16xbf16>
    %c1_107 = arith.constant 1 : index
    %c1_108 = arith.constant 1 : index
    %c0_109 = arith.constant 0 : index
    %c0_110 = arith.constant 0 : index
    %115 = vector.load %arg2[%c1_107, %c1_108, %c0_109, %c0_110] : memref<2x2x16x8xbf16, #tpu.memory_space<vmem>>, vector<1x1x16x8xbf16>
    %116 = vector.shape_cast %115 : vector<1x1x16x8xbf16> to vector<16x8xbf16>
    %cst_111 = arith.constant dense<0.000000e+00> : vector<64x8xf32>
    %117 = tpu.matmul %114, %116, %cst_111 {dimension_numbers = #tpu.dot_dimension_numbers<[1], [0], [0], [1], [0, 0, 1, 1], [], []>} : vector<64x16xbf16>, vector<16x8xbf16>, vector<64x8xf32> -> vector<64x8xf32>
    %c0_112 = arith.constant 0 : index
    %c0_113 = arith.constant 0 : index
    %118 = vector.load %arg3[%c0_112, %c0_113] : memref<1x8xf32, #tpu.memory_space<vmem>>, vector<1x8xf32>
    %119 = vector.broadcast %118 : vector<1x8xf32> to vector<64x8xf32>
    %120 = arith.addf %117, %119 : vector<64x8xf32>
    %cst_114 = arith.constant 0.000000e+00 : f32
    %121 = vector.broadcast %cst_114 : f32 to vector<64x8xf32>
    %122 = arith.maximumf %120, %121 : vector<64x8xf32>
    %123 = arith.truncf %122 : vector<64x8xf32> to vector<64x8xbf16>
    %c0_115 = arith.constant 0 : index
    %c1_116 = arith.constant 1 : index
    %c1_117 = arith.constant 1 : index
    %c0_118 = arith.constant 0 : index
    %c0_119 = arith.constant 0 : index
    %124 = vector.load %arg4[%c0_115, %c1_116, %c1_117, %c0_118, %c0_119] : memref<1x2x2x64x8xbf16, #tpu.memory_space<vmem>>, vector<1x1x1x64x8xbf16>
    %125 = vector.shape_cast %124 : vector<1x1x1x64x8xbf16> to vector<64x8xbf16>
    %126 = vector.shape_cast %123 : vector<64x8xbf16> to vector<1x1x1x64x8xbf16>
    tpu.vector_store %arg4[%c0_115, %c1_116, %c1_117, %c0_118, %c0_119], %126 {strides = array<i32>} : memref<1x2x2x64x8xbf16, #tpu.memory_space<vmem>>, vector<1x1x1x64x8xbf16>,
    %cst_120 = arith.constant dense<0.000000e+00> : vector<8xf32>
    %127 = vector.multi_reduction <add>, %122, %cst_120 [0] : vector<64x8xf32> to vector<8xf32>
    %128 = vector.shape_cast %127 : vector<8xf32> to vector<1x8xf32>
    %129 = arith.addf %96, %128 : vector<1x8xf32>
    %130 = arith.mulf %122, %122 : vector<64x8xf32>
    %cst_121 = arith.constant dense<0.000000e+00> : vector<8xf32>
    %131 = vector.multi_reduction <add>, %130, %cst_121 [0] : vector<64x8xf32> to vector<8xf32>
    %132 = vector.shape_cast %131 : vector<8xf32> to vector<1x8xf32>
    %133 = arith.addf %100, %132 : vector<1x8xf32>
    %c0_122 = arith.constant 0 : index
    %c0_123 = arith.constant 0 : index
    %c0_124 = arith.constant 0 : index
    %134 = vector.load %arg5[%c0_122, %c0_123, %c0_124] : memref<1x1x8xf32, #tpu.memory_space<vmem>>, vector<1x1x8xf32>
    %135 = vector.shape_cast %134 : vector<1x1x8xf32> to vector<1x8xf32>
    %136 = vector.shape_cast %129 : vector<1x8xf32> to vector<1x1x8xf32>
    tpu.vector_store %arg5[%c0_122, %c0_123, %c0_124], %136 {strides = array<i32>} : memref<1x1x8xf32, #tpu.memory_space<vmem>>, vector<1x1x8xf32>,
    %c0_125 = arith.constant 0 : index
    %c0_126 = arith.constant 0 : index
    %c0_127 = arith.constant 0 : index
    %137 = vector.load %arg6[%c0_125, %c0_126, %c0_127] : memref<1x1x8xf32, #tpu.memory_space<vmem>>, vector<1x1x8xf32>
    %138 = vector.shape_cast %137 : vector<1x1x8xf32> to vector<1x8xf32>
    %139 = vector.shape_cast %133 : vector<1x8xf32> to vector<1x1x8xf32>
    tpu.vector_store %arg6[%c0_125, %c0_126, %c0_127], %139 {strides = array<i32>} : memref<1x1x8xf32, #tpu.memory_space<vmem>>, vector<1x1x8xf32>,
    return
  }
  func.func @transform_0(%arg0: i32) -> (i32, i32, i32, i32) {
    %c0_i32 = arith.constant 0 : i32
    %c0_i32_0 = arith.constant 0 : i32
    %c0_i32_1 = arith.constant 0 : i32
    %c0_i32_2 = arith.constant 0 : i32
    return %arg0, %c0_i32, %c0_i32_0, %c0_i32_1 : i32, i32, i32, i32
  }
  func.func @transform_1(%arg0: i32) -> (i32, i32, i32, i32) {
    %c0_i32 = arith.constant 0 : i32
    %c0_i32_0 = arith.constant 0 : i32
    %c0_i32_1 = arith.constant 0 : i32
    %c0_i32_2 = arith.constant 0 : i32
    %c0_i32_3 = arith.constant 0 : i32
    return %c0_i32, %c0_i32_0, %c0_i32_1, %c0_i32_2 : i32, i32, i32, i32
  }
  func.func @transform_2(%arg0: i32) -> (i32, i32) {
    %c0_i32 = arith.constant 0 : i32
    %c0_i32_0 = arith.constant 0 : i32
    %c0_i32_1 = arith.constant 0 : i32
    return %c0_i32, %c0_i32_0 : i32, i32
  }
  func.func @transform_3(%arg0: i32) -> (i32, i32, i32, i32, i32) {
    %c0_i32 = arith.constant 0 : i32
    %c0_i32_0 = arith.constant 0 : i32
    %c0_i32_1 = arith.constant 0 : i32
    %c0_i32_2 = arith.constant 0 : i32
    %c0_i32_3 = arith.constant 0 : i32
    return %arg0, %c0_i32, %c0_i32_0, %c0_i32_1, %c0_i32_2 : i32, i32, i32, i32, i32
  }
  func.func @transform_4(%arg0: i32) -> (i32, i32, i32) {
    %c0_i32 = arith.constant 0 : i32
    %c0_i32_0 = arith.constant 0 : i32
    %c0_i32_1 = arith.constant 0 : i32
    return %arg0, %c0_i32, %c0_i32_0 : i32, i32, i32
  }
  func.func @transform_5(%arg0: i32) -> (i32, i32, i32) {
    %c0_i32 = arith.constant 0 : i32
    %c0_i32_0 = arith.constant 0 : i32
    %c0_i32_1 = arith.constant 0 : i32
    return %arg0, %c0_i32, %c0_i32_0 : i32, i32, i32
  }
}

module attributes {stable_mosaic.version = 11 : i64} {
  func.func @bn_interleave_kernel(%arg0: i32, %arg1: i32, %arg2: memref<1x1x2x64x8xbf16, #tpu.memory_space<vmem>>, %arg3: memref<1x8xf32, #tpu.memory_space<vmem>>, %arg4: memref<1x8xf32, #tpu.memory_space<vmem>>, %arg5: memref<1x8x1x8x16xf32, #tpu.memory_space<vmem>>) attributes {dimension_semantics = [#tpu.dimension_semantics<parallel>, #tpu.dimension_semantics<parallel>], iteration_bounds = array<i64: 2, 2>, scalar_prefetch = 0 : i64, scratch_operands = 0 : i64, tpu.core_type = #tpu.core_type<tc>, window_params = [{transform_indices = @transform_0, window_bounds = array<i64: 1, 1, 2, 64, 8>}, {pipeline_mode = #tpu.pipeline_mode<synchronous>, transform_indices = @transform_1, window_bounds = array<i64: 1, 8>}, {pipeline_mode = #tpu.pipeline_mode<synchronous>, transform_indices = @transform_2, window_bounds = array<i64: 1, 8>}, {transform_indices = @transform_3, window_bounds = array<i64: 1, 8, 1, 8, 16>}]} {
    %c0 = arith.constant 0 : index
    %c0_0 = arith.constant 0 : index
    %0 = vector.load %arg3[%c0, %c0_0] : memref<1x8xf32, #tpu.memory_space<vmem>>, vector<1x8xf32>
    %1 = vector.shape_cast %0 : vector<1x8xf32> to vector<8xf32>
    %c0_1 = arith.constant 0 : index
    %c0_2 = arith.constant 0 : index
    %2 = vector.load %arg4[%c0_1, %c0_2] : memref<1x8xf32, #tpu.memory_space<vmem>>, vector<1x8xf32>
    %3 = vector.shape_cast %2 : vector<1x8xf32> to vector<8xf32>
    %c0_3 = arith.constant 0 : index
    %c0_4 = arith.constant 0 : index
    %c0_5 = arith.constant 0 : index
    %c0_6 = arith.constant 0 : index
    %c0_7 = arith.constant 0 : index
    %4 = vector.load %arg2[%c0_3, %c0_4, %c0_5, %c0_6, %c0_7] : memref<1x1x2x64x8xbf16, #tpu.memory_space<vmem>>, vector<1x1x1x64x8xbf16>
    %5 = vector.shape_cast %4 : vector<1x1x1x64x8xbf16> to vector<64x8xbf16>
    %6 = arith.extf %5 : vector<64x8xbf16> to vector<64x8xf32>
    %7 = vector.shape_cast %1 : vector<8xf32> to vector<1x8xf32>
    %8 = vector.broadcast %7 : vector<1x8xf32> to vector<64x8xf32>
    %9 = arith.mulf %6, %8 : vector<64x8xf32>
    %10 = vector.shape_cast %3 : vector<8xf32> to vector<1x8xf32>
    %11 = vector.broadcast %10 : vector<1x8xf32> to vector<64x8xf32>
    %12 = arith.addf %9, %11 : vector<64x8xf32>
    %c0_8 = arith.constant 0 : index
    %c0_9 = arith.constant 0 : index
    %c1 = arith.constant 1 : index
    %c0_10 = arith.constant 0 : index
    %c0_11 = arith.constant 0 : index
    %13 = vector.load %arg2[%c0_8, %c0_9, %c1, %c0_10, %c0_11] : memref<1x1x2x64x8xbf16, #tpu.memory_space<vmem>>, vector<1x1x1x64x8xbf16>
    %14 = vector.shape_cast %13 : vector<1x1x1x64x8xbf16> to vector<64x8xbf16>
    %15 = arith.extf %14 : vector<64x8xbf16> to vector<64x8xf32>
    %16 = vector.shape_cast %1 : vector<8xf32> to vector<1x8xf32>
    %17 = vector.broadcast %16 : vector<1x8xf32> to vector<64x8xf32>
    %18 = arith.mulf %15, %17 : vector<64x8xf32>
    %19 = vector.shape_cast %3 : vector<8xf32> to vector<1x8xf32>
    %20 = vector.broadcast %19 : vector<1x8xf32> to vector<64x8xf32>
    %21 = arith.addf %18, %20 : vector<64x8xf32>
    %22 = tpu.concatenate %12, %21 in 1 : vector<64x8xf32>, vector<64x8xf32> -> vector<64x16xf32>
    %23 = vector.shape_cast %22 : vector<64x16xf32> to vector<8x8x16xf32>
    %c0_12 = arith.constant 0 : index
    %c0_13 = arith.constant 0 : index
    %c0_14 = arith.constant 0 : index
    %c0_15 = arith.constant 0 : index
    %c0_16 = arith.constant 0 : index
    %24 = vector.load %arg5[%c0_12, %c0_13, %c0_14, %c0_15, %c0_16] : memref<1x8x1x8x16xf32, #tpu.memory_space<vmem>>, vector<1x8x1x8x16xf32>
    %25 = vector.shape_cast %24 : vector<1x8x1x8x16xf32> to vector<8x8x16xf32>
    %26 = vector.shape_cast %23 : vector<8x8x16xf32> to vector<1x8x1x8x16xf32>
    tpu.vector_store %arg5[%c0_12, %c0_13, %c0_14, %c0_15, %c0_16], %26 {strides = array<i32>} : memref<1x8x1x8x16xf32, #tpu.memory_space<vmem>>, vector<1x8x1x8x16xf32>,
    return
  }
  func.func @transform_0(%arg0: i32, %arg1: i32) -> (i32, i32, i32, i32, i32) {
    %c0_i32 = arith.constant 0 : i32
    %c0_i32_0 = arith.constant 0 : i32
    %c0_i32_1 = arith.constant 0 : i32
    %c0_i32_2 = arith.constant 0 : i32
    return %arg0, %arg1, %c0_i32, %c0_i32_0, %c0_i32_1 : i32, i32, i32, i32, i32
  }
  func.func @transform_1(%arg0: i32, %arg1: i32) -> (i32, i32) {
    %c0_i32 = arith.constant 0 : i32
    %c0_i32_0 = arith.constant 0 : i32
    %c0_i32_1 = arith.constant 0 : i32
    return %c0_i32, %c0_i32_0 : i32, i32
  }
  func.func @transform_2(%arg0: i32, %arg1: i32) -> (i32, i32) {
    %c0_i32 = arith.constant 0 : i32
    %c0_i32_0 = arith.constant 0 : i32
    %c0_i32_1 = arith.constant 0 : i32
    return %c0_i32, %c0_i32_0 : i32, i32
  }
  func.func @transform_3(%arg0: i32, %arg1: i32) -> (i32, i32, i32, i32, i32) {
    %c0_i32 = arith.constant 0 : i32
    %c0_i32_0 = arith.constant 0 : i32
    %c0_i32_1 = arith.constant 0 : i32
    %c0_i32_2 = arith.constant 0 : i32
    return %arg0, %c0_i32, %arg1, %c0_i32_0, %c0_i32_1 : i32, i32, i32, i32, i32
  }
}

</mosaic_0001>

<bundles_post_ra>
// kernel: trans_conv_block.3
= control target key start
LH: loop header
LB: loop body
LE: loop exit
PB: predicated region body
PF: predicated region fallthrough
CT: control target
= control target key end

     0   :  { %s663_s12 = smov 0   ;;  %s665_s13 = smov 0   ;;  %s806_s0 = inlined_call_operand.vmem [shape: bf16[2,2,2,64,8], index: 0, kind: input, shape index: {}]   ;;  %s807_s1 = inlined_call_operand.vmem [shape: f32[1,8], index: 1, kind: input, shape index: {}]   ;;  %s808_s2 = inlined_call_operand.vmem [shape: f32[1,8], index: 2, kind: input, shape index: {}]   ;;  %s809_s3 = inlined_call_operand.vmem [shape: f32[2,8,2,8,16], index: 3, kind: output, shape index: {}]  }
   0x1   :  { %s667_s14 = smov 0   ;;  %s669_s15 = smov 0  }
   0x2   :  { %s671_s16 = smov 0   ;;  %s673_s17 = smov 0  }
   0x3   :  { %s675_s18 = smov 0  }
   0x4 LB: > { %s22_s19 = sadd.s32 1, %s632_s16  ;;  %s25_s20 = sadd.s32 1, %s636_s17  ;;  %s640_s18 = sphi %s675_s18, %s13_s18   ;;  %s636_s17 = sphi %s673_s17, %s816_s17   ;;  %s632_s16 = sphi %s671_s16, %s815_s16   ;;  %s628_s15 = sphi %s669_s15, %s814_s15   ;;  %s624_s14 = sphi %s667_s14, %s813_s14   ;;  %s620_s13 = sphi %s665_s13, %s812_s13   ;;  %s616_s12 = sphi %s663_s12, %s811_s12  }
   0x5   : > { %p23_p0 = scmp.ge.s32.totalorder %s22_s19, 2  ;;  %s466_s21 = sadd.s32 4294967295, %s640_s18  }
   0x6   : > { %p114_p1 = scmp.ne.s32.totalorder %s620_s13, %s616_s12  ;;  %p115_p2 = scmp.eq.s32.totalorder %s466_s21, 3 }
   0x7   : > { %s818_s19 = smov (%p23_p0, %s22_s19), 0  ;;  %s820_s20 = smov (!%p23_p0, %s25_s20), %s636_s17 }
   0x8   : > { %s100_s22 = ssub.s32 %s632_s16, %s818_s19  ;;  %p27_p3 = scmp.ge.s32.totalorder %s820_s20, 2 }
   0x9   : > { %p470_p4 = scmp.ge.s32.totalorder %s640_s18, 1  ;;  %p709_p5 = por %p115_p2, %p114_p1 }
   0xa   : > { %p157_p6 = scmp.lt.s32.totalorder %s640_s18, 5  ;;  %s822_s20 = smov (%p27_p3, %s820_s20), 0 }
   0xb   : > { %s99_s24 = ssub.s32 %s636_s17, %s822_s20  ;;  %s104_s26 = sadd.s32 1, %s620_s13 }
   0xc   : > { %p158_p7 = pnand %p470_p4, %p157_p6  ;;  %s101_s25 = sor.u32 %s100_s22, %s99_s24 }
   0xd   : > { %p102_p8 = scmp.eq.s32.totalorder %s101_s25, 0  ;;  %p184_p9 = scmp.lt.s32.totalorder (!%p158_p7), %s628_s15, 1  ;;  %v475_v0 = vld [vmem:[%s807_s1] ss:$0 sm:$0xff] (!%p158_p7)  ;;  %vm304_vm0 = vcmask (!%p158_p7), 64512   ;;  %vm313_vm1 = vcmask (!%p158_p7), 130048  }
   0xe   : > { %161 = sbr.rel (%p158_p7) target bundleno = 172 (0xac), region = 32  ;;  %p186_p10 = scmp.lt.s32.totalorder (!%p158_p7), %s624_s14, 1  ;;  %v476_v9 = vld [vmem:[%s808_s2] ss:$0 sm:$0xff] (!%p158_p7) }
   0xf   : > { %s720_s27 = scalar_select %p102_p8, %s620_s13, %s104_s26  }
  0x10   : > { %s642_s24 = smov (!%p158_p7), 8   ;;  %s181_s25 = sand.u32 (!%p158_p7), 1, %s616_s12  }
  0x11   : > { %s471_s26 = sshll.u32 (!%p158_p7), %s181_s25, 6 }
  0x15   : > { %s185_s28 = scalar_select %p184_p9, %s628_s15, 1 }
  0x16   : > { %s187_s29 = scalar_select %p186_p10, %s624_s14, 1 }
  0x17   : > { %s473_s30 = sshll.u32 %s185_s28, 5  ;;  %s746_s28 = scalar_lea.vmem [#allocation2], %s471_s26 }
  0x18   : > { %s472_s4 = sshll.u32 %s187_s29, 4  ;;  %s486_s12 = sshll.u32 (%p709_p5), %s628_s15, 4 }
  0x19   : > { %s190_s5 = sadd.s32 %s473_s30, %s472_s4  ;;  %s330_s29 = sadd.s32 (%p709_p5), %s624_s14, %s486_s12 }
  0x1a   : > { %s474_s6 = sshll.u32 %s190_s5, 2  ;;  %s487_s23 = sshll.u32 (%p709_p5), %s330_s29, 3 }
  0x1b   : > { %s192_s9 = scalar_lea.vmem %s806_s0, %s474_s6  ;;  %s332_s5 = scalar_lea.vmem (%p709_p5), %s809_s3, %s487_s23 }
  0x1c   : > { %v526_v1 = vld [vmem:[%s192_s9 + $0x28] sm:$0xff]   ;;  %v525_v2 = vld [vmem:[%s192_s9 + $0x20] sm:$0xff]   ;;  %v527_v3 = vld [vmem:[%s192_s9 + $0x30] sm:$0xff]  }
  0x1d   : > { %v512_v4 = vunpack.c.l.bf16 %v526_v1  ;;  %v513_v5 = vunpack.c.h.bf16 %v526_v1  ;;  %v508_v6 = vunpack.c.l.bf16 %v525_v2  ;;  %v509_v7 = vunpack.c.h.bf16 %v525_v2  ;;  %v528_v8 = vld [vmem:[%s192_s9 + $0x38] sm:$0xff]   ;;  %v522_v20 = vld [vmem:[%s192_s9 + $0x8] sm:$0xff]   ;;  %v491_v21 = vld [vmem:[%s192_s9] sm:$0xff]  }
  0x1e   : > { %v517_v10 = vunpack.c.h.bf16 %v527_v3  ;;  %v516_v11 = vunpack.c.l.bf16 %v527_v3  ;;  %v521_v12 = vunpack.c.h.bf16 %v528_v8  ;;  %v520_v13 = vunpack.c.l.bf16 %v528_v8  ;;  %v523_v26 = vld [vmem:[%s192_s9 + $0x10] sm:$0xff]   ;;  %v524_v27 = vld [vmem:[%s192_s9 + $0x18] sm:$0xff]  }
  0x1f   : > { %v258_v14 = vmul.f32 %v512_v4, %v475_v0  ;;  %v256_v15 = vmul.f32 %v508_v6, %v475_v0  ;;  %v259_v16 = vmul.f32 %v513_v5, %v475_v0  ;;  %v257_v17 = vmul.f32 %v509_v7, %v475_v0 }
  0x20   : > { %v261_v18 = vmul.f32 %v517_v10, %v475_v0  ;;  %v260_v19 = vmul.f32 %v516_v11, %v475_v0  ;;  %v263_v24 = vmul.f32 %v521_v12, %v475_v0  ;;  %v262_v25 = vmul.f32 %v520_v13, %v475_v0 }
  0x21   : > { %v266_v22 = vadd.f32 %v476_v9, %v258_v14  ;;  %v264_v23 = vadd.f32 %v476_v9, %v256_v15  ;;  %v267_v28 = vadd.f32 %v476_v9, %v259_v16  ;;  %v265_v29 = vadd.f32 %v476_v9, %v257_v17 }
  0x22   : > { %v269_v30 = vadd.f32 %v476_v9, %v261_v18  ;;  %v268_v31 = vadd.f32 %v476_v9, %v260_v19  ;;  %v496_v32 = vunpack.c.l.bf16 %v522_v20  ;;  %v492_v33 = vunpack.c.l.bf16 %v491_v21 }
  0x23   : > { %284 = vrot.lane.b32.xlu1 %v266_v22, %s642_s24  ;;  %280 = vrot.lane.b32.xlu0 %v264_v23, %s642_s24  ;;  %v497_v34 = vunpack.c.h.bf16 %v522_v20  ;;  %v493_v35 = vunpack.c.h.bf16 %v491_v21  ;;  %v501_v36 = vunpack.c.h.bf16 %v523_v26  ;;  %v500_v37 = vunpack.c.l.bf16 %v523_v26 }
  0x24   : > { %v505_v38 = vunpack.c.h.bf16 %v524_v27  ;;  %v504_v39 = vunpack.c.l.bf16 %v524_v27  ;;  %v219_v40 = vmul.f32 %v496_v32, %v475_v0  ;;  %v217_v41 = vmul.f32 %v492_v33, %v475_v0 }
  0x25   : > { %v220_v42 = vmul.f32 %v497_v34, %v475_v0  ;;  %v218_v43 = vmul.f32 %v493_v35, %v475_v0  ;;  %v222_v44 = vmul.f32 %v501_v36, %v475_v0  ;;  %v221_v45 = vmul.f32 %v500_v37, %v475_v0 }
  0x26   : > { %v224_v46 = vmul.f32 %v505_v38, %v475_v0  ;;  %v223_v47 = vmul.f32 %v504_v39, %v475_v0  ;;  %v233_v48 = vadd.f32 %v476_v9, %v219_v40  ;;  %v231_v49 = vadd.f32 %v476_v9, %v217_v41 }
  0x27   : > { %286 = vrot.lane.b32.xlu1 %v267_v28, %s642_s24  ;;  %282 = vrot.lane.b32.xlu0 %v265_v29, %s642_s24  ;;  %v234_v50 = vadd.f32 %v476_v9, %v220_v42  ;;  %v232_v51 = vadd.f32 %v476_v9, %v218_v43  ;;  %v236_v52 = vadd.f32 %v476_v9, %v222_v44 }
  0x28   : > { %v235_v53 = vadd.f32 %v476_v9, %v221_v45  ;;  %v238_v54 = vadd.f32 %v476_v9, %v224_v46  ;;  %v237_v55 = vadd.f32 %v476_v9, %v223_v47  ;;  %v271_v56 = vadd.f32 %v476_v9, %v263_v24 }
  0x29   : > { %v270_v57 = vadd.f32 %v476_v9, %v262_v25 }
  0x2b   : > { %290 = vrot.lane.b32.xlu1 %v269_v30, %s642_s24  ;;  %288 = vrot.lane.b32.xlu0 %v268_v31, %s642_s24 }
  0x2f   : > { %294 = vrot.lane.b32.xlu1 %v271_v56, %s642_s24  ;;  %292 = vrot.lane.b32.xlu0 %v270_v57, %s642_s24 }
  0x95   : > { %v285_v58 = vpop.permute.xlu1 %284  ;;  %v281_v59 = vpop.permute.xlu0 %280 }
  0x96   : > { %v307_v60 = vsel %vm304_vm0, %v233_v48, %v285_v58  ;;  %v305_v61 = vsel %vm304_vm0, %v231_v49, %v281_v59 }
  0x97   : > { %316 = vst.msk [vmem:[%s746_s28 + $0x10] sm:$0xff] %vm313_vm1, %v307_v60  ;;  %314 = vst.msk [vmem:[%s746_s28] sm:$0xff] %vm313_vm1, %v305_v61 }
  0x99   : > { %v287_v62 = vpop.permute.xlu1 %286  ;;  %v283_v63 = vpop.permute.xlu0 %282 }
  0x9a   : > { %v308_v0 = vsel %vm304_vm0, %v234_v50, %v287_v62  ;;  %v306_v1 = vsel %vm304_vm0, %v232_v51, %v283_v63 }
  0x9b   : > { %317 = vst.msk [vmem:[%s746_s28 + $0x18] sm:$0xff] %vm313_vm1, %v308_v0  ;;  %315 = vst.msk [vmem:[%s746_s28 + $0x8] sm:$0xff] %vm313_vm1, %v306_v1 }
  0x9d   : > { %v291_v2 = vpop.permute.xlu1 %290  ;;  %v289_v3 = vpop.permute.xlu0 %288  ;;  %328 = sbr.rel (!%p709_p5) target bundleno = 172 (0xac), region = 36 }
  0x9e   : > { %v310_v4 = vsel %vm304_vm0, %v236_v52, %v291_v2  ;;  %v309_v5 = vsel %vm304_vm0, %v235_v53, %v289_v3  ;;  %v374_v10 = vld [vmem:[%s746_s28] sm:$0xff] (%p709_p5)  ;;  %v378_v12 = vld [vmem:[%s746_s28 + $0x10] sm:$0xff] (%p709_p5) }
  0x9f   : > { %319 = vst.msk [vmem:[%s746_s28 + $0x28] sm:$0xff] %vm313_vm1, %v310_v4  ;;  %318 = vst.msk [vmem:[%s746_s28 + $0x20] sm:$0xff] %vm313_vm1, %v309_v5 }
  0xa0   : > { %375 = vst [vmem:[%s332_s5] sm:$0xff] (%p709_p5), %v374_v10  ;;  %379 = vst [vmem:[%s332_s5 + $0x20] sm:$0xff] (%p709_p5), %v378_v12 }
  0xa1   : > { %v295_v6 = vpop.permute.xlu1 %294  ;;  %v293_v7 = vpop.permute.xlu0 %292 }
  0xa2   : > { %v312_v8 = vsel %vm304_vm0, %v238_v54, %v295_v6  ;;  %v311_v9 = vsel %vm304_vm0, %v237_v55, %v293_v7  ;;  %v376_v11 = vld [vmem:[%s746_s28 + $0x8] sm:$0xff] (%p709_p5)  ;;  %v380_v13 = vld [vmem:[%s746_s28 + $0x18] sm:$0xff] (%p709_p5) }
  0xa3   : > { %321 = vst.msk [vmem:[%s746_s28 + $0x38] sm:$0xff] %vm313_vm1, %v312_v8  ;;  %320 = vst.msk [vmem:[%s746_s28 + $0x30] sm:$0xff] %vm313_vm1, %v311_v9 }
  0xa4   : > { %377 = vst [vmem:[%s332_s5 + $0x10] sm:$0xff] %v376_v11  ;;  %381 = vst [vmem:[%s332_s5 + $0x30] sm:$0xff] %v380_v13 }
  0xa6   : > { %v382_v14 = vld [vmem:[%s746_s28 + $0x20] sm:$0xff]  ;;  %v384_v15 = vld [vmem:[%s746_s28 + $0x28] sm:$0xff] }
  0xa7   : > { %383 = vst [vmem:[%s332_s5 + $0x40] sm:$0xff] %v382_v14  ;;  %385 = vst [vmem:[%s332_s5 + $0x50] sm:$0xff] %v384_v15 }
  0xaa   : > { %v386_v16 = vld [vmem:[%s746_s28 + $0x30] sm:$0xff]  ;;  %v388_v17 = vld [vmem:[%s746_s28 + $0x38] sm:$0xff] }
  0xab   : > { %387 = vst [vmem:[%s332_s5 + $0x60] sm:$0xff] %v386_v16  ;;  %389 = vst [vmem:[%s332_s5 + $0x70] sm:$0xff] %v388_v17 }
  0xac PF: > { %s13_s18 = sadd.s32 1, %s640_s18   ;;  %s811_s12 = smov %s620_s13 }
  0xad   : > { %p10_p11 = scmp.ge.s32.totalorder %s13_s18, 6   ;;  %s812_s13 = smov %s720_s27 }
  0xae   : > { %s813_s14 = smov %s632_s16  ;;  %s814_s15 = smov %s636_s17 }
  0xaf   : > { %s815_s16 = smov %s818_s19  ;;  %s816_s17 = smov %s822_s20 }
  0xb0   :  { %12 = sbr.rel (!%p10_p11) target bundleno = 4 (0x4), region = 101 }

// kernel: trans_conv_block.2
= control target key start
LH: loop header
LB: loop body
LE: loop exit
PB: predicated region body
PF: predicated region fallthrough
CT: control target
= control target key end

     0   :  { %s2338_s18 = smov 0   ;;  %s2875_s0 = inlined_call_operand.vmem [shape: f32[2,10,10,4], index: 0, kind: input, shape index: {}]   ;;  %s2876_s1 = inlined_call_operand.vmem [shape: bf16[2,2,16,8], index: 1, kind: input, shape index: {}]   ;;  %s2877_s2 = inlined_call_operand.vmem [shape: f32[1,8], index: 2, kind: input, shape index: {}]   ;;  %s2878_s3 = inlined_call_operand.vmem [shape: bf16[2,2,2,64,8], index: 3, kind: output, shape index: {0}]   ;;  %s2879_s4 = inlined_call_operand.vmem [shape: f32[2,1,8], index: 4, kind: output, shape index: {1}]   ;;  %s2880_s5 = inlined_call_operand.vmem [shape: f32[2,1,8], index: 5, kind: output, shape index: {2}]  }
   0x1 LB: > { %s1756_s19 = sadd.s32 4294967295, %s2303_s18   ;;  %p1760_p0 = scmp.ge.s32.totalorder %s2303_s18, 1  ;;  %s2303_s18 = sphi %s2338_s18, %s16_s18  }
   0x2   : > { %p192_p1 = scmp.lt.s32.totalorder %s2303_s18, 3 }
   0x4   : > { %p193_p2 = pnand %p1760_p0, %p192_p1 }
   0x5   : > { %p226_p3 = scmp.lt.s32.totalorder (!%p193_p2), %s1756_s19, 1  ;;  %s2305_s24 = smov (!%p193_p2), 8   ;;  %v2293_v16 = vld [vmem:[%s2876_s1] sm:$0xff] (!%p193_p2)   ;;  %v2294_v18 = vld [vmem:[%s2876_s1 + $0x8] sm:$0xff] (!%p193_p2)   ;;  %v2481_v48 = vld [vmem:[%s2876_s1 + $0x10] sm:$0xff] (!%p193_p2)   ;;  %vm372_vm0 = vcmask (!%p193_p2), 31744  }
   0x6   : > { %196 = sbr.rel (%p193_p2) target bundleno = 479 (0x1df), region = 32  ;;  %s2306_s25 = smov (!%p193_p2), 4   ;;  %2001 = vmatprep.subr.bf16.mxu0 (!%p193_p2), %v2293_v16  ;;  %2011 = vmatprep.subr.bf16.mxu1 (!%p193_p2), %v2294_v18  ;;  %v2495_v49 = vld [vmem:[%s2876_s1 + $0x18] sm:$0xff] (!%p193_p2)   ;;  %vm381_vm1 = vcmask (!%p193_p2), 64512   ;;  %vm390_vm2 = vcmask (!%p193_p2), 97280   ;;  %vm418_vm3 = vcmask (!%p193_p2), 130048  }
   0x7   : > { %s2307_s30 = smov (!%p193_p2), 12   ;;  %2002 = vmatpush3.bf16.msra.mxu0 (!%p193_p2), %v2293_v16  ;;  %2012 = vmatpush3.bf16.msra.mxu1 (!%p193_p2), %v2294_v18  ;;  %vm536_vm4 = vcmask (!%p193_p2), 60416   ;;  %vm1648_vm5 = vcmask (!%p193_p2), 57344  }
   0x8   : > { %2021 = vmatprep.subr.bf16.mxu0 (!%p193_p2), %v2481_v48  ;;  %2031 = vmatprep.subr.bf16.mxu1 (!%p193_p2), %v2495_v49 }
   0xd   : > { %s2882_s19 = smov (!%p226_p3, %s1756_s19), 1 }
   0xe   : > { %s2041_s20 = smul.u32 160, %s2882_s19  ;;  %s1948_s12 = sshll.u32 %s2882_s19, 7 }
   0xf   : > { %s2696_s15 = scalar_lea.vmem %s2878_s3, %s1948_s12 }
  0x10   : > { %s2352_s23 = scalar_lea.vmem %s2875_s0, %s2041_s20  ;;  %s238_s20 = scalar_lea.vmem %s2879_s4, %s2882_s19 }
  0x11   : > { %v260_v0 = vld [vmem:[%s2352_s23 + $0x1] sm:$0xff]  ;;  %v2356_v1 = vld [vmem:[%s2352_s23 + $0x11] sm:$0xff] }
  0x12   : > { %v1772_v2 = vld [vmem:[%s2352_s23 + $0x10] sm:$0xff]  ;;  %v2063_v3 = vpack.i.bf16 %v2356_v1, %v260_v0  ;;  %v1773_v4 = vld [vmem:[%s2352_s23 + $0x20] sm:$0xff] }
  0x13   : > { %v2362_v5 = vld [vmem:[%s2352_s23 + $0x21] sm:$0xff]  ;;  %v2365_v6 = vld [vmem:[%s2352_s23 + $0x31] sm:$0xff]  ;;  %v2367_v7 = vpack.i.bf16 %v1773_v4, %v1772_v2 }
  0x14   : > { %v1774_v8 = vld [vmem:[%s2352_s23 + $0x30] sm:$0xff]  ;;  %v1775_v9 = vld [vmem:[%s2352_s23 + $0x40] sm:$0xff]  ;;  %2064 = vrot.lane.b32.xlu1 %v2063_v3, %s2305_s24  ;;  %v2374_v10 = vpack.i.bf16 %v2365_v6, %v2362_v5  ;;  %v2385_v13 = vpack.i.bf16 %v2362_v5, %v2356_v1 }
  0x15   : > { %2054 = vrot.lane.b32.xlu0 %v2367_v7, %s2306_s25  ;;  %v2378_v11 = vpack.i.bf16 %v1775_v9, %v1774_v8  ;;  %v268_v12 = vld [vmem:[%s2352_s23] sm:$0xff]  ;;  %v2083_v19 = vpack.i.bf16 %v1774_v8, %v1773_v4  ;;  %v2409_v21 = vld [vmem:[%s2352_s23 + $0x32] sm:$0xff] }
  0x16   : > { %v2073_v14 = vpack.i.bf16 %v1772_v2, %v268_v12  ;;  %v2390_v15 = vld [vmem:[%s2352_s23 + $0x41] sm:$0xff]  ;;  %v2413_v23 = vld [vmem:[%s2352_s23 + $0x12] sm:$0xff] }
  0x17   : > { %v2399_v17 = vpack.i.bf16 %v2390_v15, %v2365_v6  ;;  %v2406_v20 = vld [vmem:[%s2352_s23 + $0x22] sm:$0xff]  ;;  %v1778_v26 = vld [vmem:[%s2352_s23 + $0x70] sm:$0xff] }
  0x18   : > { %2069 = vrot.lane.b32.xlu1 %v2374_v10, %s2305_s24  ;;  %v613_v22 = vld [vmem:[%s2352_s23 + $0x2] sm:$0xff]  ;;  %v2098_v24 = vpack.i.bf16 %v2409_v21, %v2406_v20  ;;  %v1776_v28 = vld [vmem:[%s2352_s23 + $0x50] sm:$0xff]  ;;  %v2213_v51 = vpack.i.bf16 %v2406_v20, %v2413_v23 }
  0x19   : > { %2059 = vrot.lane.b32.xlu0 %v2378_v11, %s2306_s25  ;;  %v2093_v25 = vpack.i.bf16 %v2413_v23, %v613_v22  ;;  %v1779_v27 = vld [vmem:[%s2352_s23 + $0x80] sm:$0xff]  ;;  %v2434_v33 = vld [vmem:[%s2352_s23 + $0x71] sm:$0xff]  ;;  %v2133_v38 = vpack.i.bf16 %v1776_v28, %v1775_v9 }
  0x1a   : > { %v1777_v29 = vld [vmem:[%s2352_s23 + $0x60] sm:$0xff]  ;;  %v2118_v30 = vpack.i.bf16 %v1779_v27, %v1778_v26  ;;  %v2437_v34 = vld [vmem:[%s2352_s23 + $0x51] sm:$0xff] }
  0x1b   : > { %v2113_v31 = vpack.i.bf16 %v1777_v29, %v1776_v28  ;;  %v2431_v32 = vld [vmem:[%s2352_s23 + $0x61] sm:$0xff]  ;;  %v2123_v36 = vpack.i.bf16 %v2437_v34, %v2390_v15  ;;  %v2143_v41 = vpack.i.bf16 %v1778_v26, %v1777_v29  ;;  %v2460_v43 = vld [vmem:[%s2352_s23 + $0x72] sm:$0xff] }
  0x1c   : > { %2079 = vrot.lane.b32.xlu1 %v2385_v13, %s2306_s25  ;;  %v2128_v35 = vpack.i.bf16 %v2434_v33, %v2431_v32  ;;  %v2138_v37 = vpack.i.bf16 %v2431_v32, %v2437_v34  ;;  %v2450_v39 = vld [vmem:[%s2352_s23 + $0x81] sm:$0xff]  ;;  %v2466_v45 = vld [vmem:[%s2352_s23 + $0x52] sm:$0xff] }
  0x1d   : > { %2074 = vrot.lane.b32.xlu0 %v2073_v14, %s2307_s30  ;;  %v2148_v40 = vpack.i.bf16 %v2450_v39, %v2434_v33  ;;  %v2457_v42 = vld [vmem:[%s2352_s23 + $0x62] sm:$0xff]  ;;  %v1849_v52 = vld [vmem:[%s2352_s23 + $0x90] sm:$0xff] }
  0x1e   : > { %v2463_v44 = vld [vmem:[%s2352_s23 + $0x42] sm:$0xff]  ;;  %v2158_v46 = vpack.i.bf16 %v2460_v43, %v2457_v42  ;;  %v2238_v53 = vpack.i.bf16 %v1849_v52, %v1779_v27  ;;  %v2519_v54 = vld [vmem:[%s2352_s23 + $0x91] sm:$0xff]  ;;  %v2273_v58 = vpack.i.bf16 %v2457_v42, %v2466_v45 }
  0x1f   : > { %v2153_v47 = vpack.i.bf16 %v2466_v45, %v2463_v44  ;;  %v2218_v50 = vpack.i.bf16 %v2463_v44, %v2409_v21  ;;  %v2268_v55 = vpack.i.bf16 %v2519_v54, %v2450_v39  ;;  %v2526_v56 = vld [vmem:[%s2352_s23 + $0x82] sm:$0xff] }
  0x20   : > { %2089 = vrot.lane.b32.xlu1 %v2399_v17, %s2306_s25  ;;  %v2278_v57 = vpack.i.bf16 %v2526_v56, %v2460_v43 }
  0x21   : > { %2084 = vrot.lane.b32.xlu0 %v2083_v19, %s2307_s30 }
  0x24   : > { %2099 = vrot.lane.b32.xlu1 %v2098_v24, %s2305_s24 }
  0x25   : > { %2094 = vrot.lane.b32.xlu0 %v2093_v25, %s2305_s24 }
  0x28   : > { %2109 = vrot.lane.b32.xlu1 %v2374_v10, %s2307_s30 }
  0x29   : > { %2104 = vrot.lane.b32.xlu0 %v2063_v3, %s2307_s30 }
  0x2c   : > { %2119 = vrot.lane.b32.xlu1 %v2118_v30, %s2306_s25 }
  0x2d   : > { %2114 = vrot.lane.b32.xlu0 %v2113_v31, %s2306_s25 }
  0x30   : > { %2129 = vrot.lane.b32.xlu1 %v2128_v35, %s2305_s24 }
  0x31   : > { %2124 = vrot.lane.b32.xlu0 %v2123_v36, %s2305_s24 }
  0x34   : > { %2139 = vrot.lane.b32.xlu1 %v2138_v37, %s2306_s25 }
  0x35   : > { %2134 = vrot.lane.b32.xlu0 %v2133_v38, %s2307_s30 }
  0x38   : > { %2149 = vrot.lane.b32.xlu1 %v2148_v40, %s2306_s25 }
  0x39   : > { %2144 = vrot.lane.b32.xlu0 %v2143_v41, %s2307_s30 }
  0x3c   : > { %2159 = vrot.lane.b32.xlu1 %v2158_v46, %s2305_s24 }
  0x3d   : > { %2154 = vrot.lane.b32.xlu0 %v2153_v47, %s2305_s24 }
  0x40   : > { %2169 = vrot.lane.b32.xlu1 %v2128_v35, %s2307_s30 }
  0x41   : > { %2164 = vrot.lane.b32.xlu0 %v2123_v36, %s2307_s30 }
  0x44   : > { %2179 = vrot.lane.b32.xlu1 %v2133_v38, %s2306_s25 }
  0x45   : > { %2174 = vrot.lane.b32.xlu0 %v2083_v19, %s2306_s25 }
  0x48   : > { %2189 = vrot.lane.b32.xlu1 %v2399_v17, %s2305_s24 }
  0x49   : > { %2184 = vrot.lane.b32.xlu0 %v2385_v13, %s2305_s24 }
  0x4c   : > { %2199 = vrot.lane.b32.xlu1 %v2374_v10, %s2306_s25 }
  0x4d   : > { %2194 = vrot.lane.b32.xlu0 %v2367_v7, %s2307_s30 }
  0x50   : > { %2209 = vrot.lane.b32.xlu1 %v2123_v36, %s2306_s25 }
  0x51   : > { %2204 = vrot.lane.b32.xlu0 %v2378_v11, %s2307_s30 }
  0x54   : > { %2219 = vrot.lane.b32.xlu1 %v2218_v50, %s2305_s24 }
  0x55   : > { %2214 = vrot.lane.b32.xlu0 %v2213_v51, %s2305_s24 }
  0x58   : > { %2229 = vrot.lane.b32.xlu1 %v2399_v17, %s2307_s30 }
  0x59   : > { %2224 = vrot.lane.b32.xlu0 %v2385_v13, %s2307_s30 }
  0x5c   : > { %2239 = vrot.lane.b32.xlu1 %v2238_v53, %s2306_s25 }
  0x5d   : > { %2234 = vrot.lane.b32.xlu0 %v2143_v41, %s2306_s25 }
  0x60   : > { %2249 = vrot.lane.b32.xlu1 %v2148_v40, %s2305_s24 }
  0x61   : > { %2244 = vrot.lane.b32.xlu0 %v2138_v37, %s2305_s24 }
  0x64   : > { %2259 = vrot.lane.b32.xlu1 %v2128_v35, %s2306_s25 }
  0x65   : > { %2254 = vrot.lane.b32.xlu0 %v2113_v31, %s2307_s30 }
  0x68   : > { %2269 = vrot.lane.b32.xlu1 %v2268_v55, %s2306_s25 }
  0x69   : > { %2264 = vrot.lane.b32.xlu0 %v2118_v30, %s2307_s30 }
  0x6c   : > { %2279 = vrot.lane.b32.xlu1 %v2278_v57, %s2305_s24 }
  0x6d   : > { %2274 = vrot.lane.b32.xlu0 %v2273_v58, %s2305_s24 }
  0x70   : > { %2289 = vrot.lane.b32.xlu1 %v2148_v40, %s2307_s30 }
  0x71   : > { %2284 = vrot.lane.b32.xlu0 %v2138_v37, %s2307_s30 }
  0x86   : > { %v2065_v59 = vpop.permute.xlu1 %2064 }
  0x87   : > { %v2055_v60 = vpop.permute.xlu0 %2054  ;;  %v2067_v2 = vunpack.i.h.bf16 %v2065_v59  ;;  %v2066_v3 = vunpack.i.l.bf16 %v2065_v59 }
  0x88   : > { %v2057_v61 = vunpack.i.h.bf16 %v2055_v60  ;;  %v2056_v62 = vunpack.i.l.bf16 %v2055_v60 }
  0x8a   : > { %v2070_v63 = vpop.permute.xlu1 %2069  ;;  %v373_v4 = vsel %vm372_vm0, %v2356_v1, %v2056_v62  ;;  %v374_v7 = vsel %vm372_vm0, %v2362_v5, %v2057_v61 }
  0x8b   : > { %v2060_v0 = vpop.permute.xlu0 %2059  ;;  %v2072_v14 = vunpack.i.h.bf16 %v2070_v63  ;;  %v2071_v16 = vunpack.i.l.bf16 %v2070_v63  ;;  %v382_v17 = vsel %vm381_vm1, %v373_v4, %v2066_v3  ;;  %v383_v18 = vsel %vm381_vm1, %v374_v7, %v2067_v2 }
  0x8c   : > { %v2062_v8 = vunpack.i.h.bf16 %v2060_v0  ;;  %v2061_v9 = vunpack.i.l.bf16 %v2060_v0 }
  0x8e   : > { %v2080_v10 = vpop.permute.xlu1 %2079  ;;  %v375_v1 = vsel %vm372_vm0, %v2365_v6, %v2061_v9  ;;  %v376_v19 = vsel %vm372_vm0, %v2390_v15, %v2062_v8 }
  0x8f   : > { %v2075_v11 = vpop.permute.xlu0 %2074  ;;  %v384_v30 = vsel %vm381_vm1, %v375_v1, %v2071_v16  ;;  %v385_v31 = vsel %vm381_vm1, %v376_v19, %v2072_v14  ;;  %v2082_v35 = vunpack.i.h.bf16 %v2080_v10  ;;  %v2081_v36 = vunpack.i.l.bf16 %v2080_v10 }
  0x90   : > { %v2077_v12 = vunpack.i.h.bf16 %v2075_v11  ;;  %v2076_v13 = vunpack.i.l.bf16 %v2075_v11 }
  0x91   : > { %v726_v57 = vsel %vm372_vm0, %v2406_v20, %v2082_v35  ;;  %v725_v58 = vsel %vm372_vm0, %v2413_v23, %v2081_v36 }
  0x92   : > { %v2090_v22 = vpop.permute.xlu1 %2089  ;;  %v391_v24 = vsel %vm390_vm2, %v382_v17, %v2076_v13  ;;  %v392_v25 = vsel %vm390_vm2, %v383_v18, %v2077_v12 }
  0x93   : > { %v2085_v26 = vpop.permute.xlu0 %2084  ;;  %v399_v27 = vpack.c.bf16 %v392_v25, %v391_v24  ;;  %v2092_v41 = vunpack.i.h.bf16 %v2090_v22  ;;  %v2091_v46 = vunpack.i.l.bf16 %v2090_v22 }
  0x94   : > { %v2087_v28 = vunpack.i.h.bf16 %v2085_v26  ;;  %v2086_v29 = vunpack.i.l.bf16 %v2085_v26 }
  0x95   : > { %2003 = vmatprep.mubr.msk.bf16.mxu0 %vm418_vm3, %v399_v27  ;;  %v728_v60 = vsel %vm372_vm0, %v2463_v44, %v2092_v41  ;;  %v727_v61 = vsel %vm372_vm0, %v2409_v21, %v2091_v46 }
  0x96   : > { %v393_v37 = vsel %vm390_vm2, %v384_v30, %v2086_v29  ;;  %v394_v38 = vsel %vm390_vm2, %v385_v31, %v2087_v28  ;;  %v2100_v40 = vpop.permute.xlu1 %2099 }
  0x97   : > { %v400_v47 = vpack.c.bf16 %v394_v38, %v393_v37  ;;  %v2095_v50 = vpop.permute.xlu0 %2094  ;;  %v2102_v51 = vunpack.i.h.bf16 %v2100_v40  ;;  %v2101_v52 = vunpack.i.l.bf16 %v2100_v40 }
  0x98   : > { %v2097_v53 = vunpack.i.h.bf16 %v2095_v50  ;;  %v2096_v55 = vunpack.i.l.bf16 %v2095_v50 }
  0x99   : > { %2004 = vmatmul.mubr.msk.bf16.vlgmr.msra.gmra.mrb[0].mxu0 %vm418_vm3, %v400_v47  ;;  %v735_v2 = vsel %vm381_vm1, %v727_v61, %v2101_v52  ;;  %v736_v3 = vsel %vm381_vm1, %v728_v60, %v2102_v51 }
  0x9a   : > { %v2110_v59 = vpop.permute.xlu1 %2109  ;;  %2022 = vmatpush3.bf16.msra.mxu0 %v2481_v48  ;;  %v733_v48 = vsel %vm381_vm1, %v725_v58, %v2096_v55  ;;  %v734_v9 = vsel %vm381_vm1, %v726_v57, %v2097_v53 }
  0x9b   : > { %v2112_v62 = vunpack.i.h.bf16 %v2110_v59  ;;  %v2111_v63 = vunpack.i.l.bf16 %v2110_v59  ;;  %v2105_v0 = vpop.permute.xlu0 %2104 }
  0x9c   : > { %v2107_v4 = vunpack.i.h.bf16 %v2105_v0  ;;  %v2106_v7 = vunpack.i.l.bf16 %v2105_v0 }
  0x9d   : > { %v743_v23 = vsel %vm390_vm2, %v735_v2, %v2111_v63  ;;  %v744_v8 = vsel %vm390_vm2, %v736_v3, %v2112_v62 }
  0x9e   : > { %v750_v10 = vpack.c.bf16 %v744_v8, %v743_v23  ;;  %v2120_v11 = vpop.permute.xlu1 %2119  ;;  %v741_v12 = vsel %vm390_vm2, %v733_v48, %v2106_v7  ;;  %v742_v13 = vsel %vm390_vm2, %v734_v9, %v2107_v4 }
  0x9f   : > { %v2115_v14 = vpop.permute.xlu0 %2114  ;;  %v749_v16 = vpack.c.bf16 %v742_v13, %v741_v12  ;;  %v2122_v26 = vunpack.i.h.bf16 %v2120_v11  ;;  %v2121_v27 = vunpack.i.l.bf16 %v2120_v11 }
  0xa0   : > { %v2117_v1 = vunpack.i.h.bf16 %v2115_v14  ;;  %v2116_v19 = vunpack.i.l.bf16 %v2115_v14 }
  0xa1   : > { %2013 = vmatprep.mubr.msk.bf16.mxu1 %vm418_vm3, %v749_v16  ;;  %v379_v51 = vsel %vm372_vm0, %v2434_v33, %v2121_v27  ;;  %v380_v52 = vsel %vm372_vm0, %v2450_v39, %v2122_v26 }
  0xa2   : > { %2014 = vmatmul.mubr.msk.bf16.vlgmr.msra.gmra.mrb[0].mxu1 %vm418_vm3, %v750_v10  ;;  %v2130_v17 = vpop.permute.xlu1 %2129  ;;  %v377_v29 = vsel %vm372_vm0, %v2437_v34, %v2116_v19  ;;  %v378_v30 = vsel %vm372_vm0, %v2431_v32, %v2117_v1 }
  0xa3   : > { %v2125_v18 = vpop.permute.xlu0 %2124  ;;  %2032 = vmatpush3.bf16.msra.mxu1 %v2495_v49  ;;  %v2132_v36 = vunpack.i.h.bf16 %v2130_v17  ;;  %v2131_v37 = vunpack.i.l.bf16 %v2130_v17 }
  0xa4   : > { %v2127_v22 = vunpack.i.h.bf16 %v2125_v18  ;;  %v2126_v24 = vunpack.i.l.bf16 %v2125_v18 }
  0xa5   : > { %v388_v57 = vsel %vm381_vm1, %v379_v51, %v2131_v37  ;;  %v389_v58 = vsel %vm381_vm1, %v380_v52, %v2132_v36 }
  0xa6   : > { %v2140_v25 = vpop.permute.xlu1 %2139  ;;  %v386_v49 = vsel %vm381_vm1, %v377_v29, %v2126_v24  ;;  %v387_v38 = vsel %vm381_vm1, %v378_v30, %v2127_v22 }
  0xa7   : > { %v2135_v28 = vpop.permute.xlu0 %2134  ;;  %v2142_v59 = vunpack.i.h.bf16 %v2140_v25  ;;  %v2141_v60 = vunpack.i.l.bf16 %v2140_v25 }
  0xa8   : > { %v2137_v31 = vunpack.i.h.bf16 %v2135_v28  ;;  %v2136_v35 = vunpack.i.l.bf16 %v2135_v28 }
  0xa9   : > { %v730_v9 = vsel %vm372_vm0, %v2457_v42, %v2142_v59  ;;  %v729_v10 = vsel %vm372_vm0, %v2466_v45, %v2141_v60 }
  0xaa   : > { %v395_v40 = vsel %vm390_vm2, %v386_v49, %v2136_v35  ;;  %v396_v41 = vsel %vm390_vm2, %v387_v38, %v2137_v31  ;;  %v2150_v46 = vpop.permute.xlu1 %2149 }
  0xab   : > { %v401_v47 = vpack.c.bf16 %v396_v41, %v395_v40  ;;  %v2145_v50 = vpop.permute.xlu0 %2144  ;;  %v2152_v0 = vunpack.i.h.bf16 %v2150_v46  ;;  %v2151_v2 = vunpack.i.l.bf16 %v2150_v46 }
  0xac   : > { %v2147_v53 = vunpack.i.h.bf16 %v2145_v50  ;;  %v2146_v55 = vunpack.i.l.bf16 %v2145_v50 }
  0xad   : > { %2007 = vmatprep.mubr.msk.bf16.mxu0 %vm418_vm3, %v401_v47  ;;  %v732_v12 = vsel %vm372_vm0, %v2526_v56, %v2152_v0  ;;  %v731_v13 = vsel %vm372_vm0, %v2460_v43, %v2151_v2 }
  0xae   : > { %v397_v61 = vsel %vm390_vm2, %v388_v57, %v2146_v55  ;;  %v398_v62 = vsel %vm390_vm2, %v389_v58, %v2147_v53  ;;  %v2160_v63 = vpop.permute.xlu1 %2159 }
  0xaf   : > { %v402_v3 = vpack.c.bf16 %v398_v62, %v397_v61  ;;  %v2155_v4 = vpop.permute.xlu0 %2154  ;;  %v2162_v7 = vunpack.i.h.bf16 %v2160_v63  ;;  %v2161_v23 = vunpack.i.l.bf16 %v2160_v63 }
  0xb0   : > { %v2157_v8 = vunpack.i.h.bf16 %v2155_v4  ;;  %v2156_v48 = vunpack.i.l.bf16 %v2155_v4 }
  0xb1   : > { %2008 = vmatmul.mubr.msk.bf16.gmra.mrb[4].mxu0 %vm418_vm3, %v402_v3  ;;  %v739_v18 = vsel %vm381_vm1, %v731_v13, %v2161_v23  ;;  %v740_v1 = vsel %vm381_vm1, %v732_v12, %v2162_v7 }
  0xb2   : > { %v2170_v11 = vpop.permute.xlu1 %2169  ;;  %v738_v24 = vsel %vm381_vm1, %v730_v9, %v2157_v8  ;;  %v737_v25 = vsel %vm381_vm1, %v729_v10, %v2156_v48 }
  0xb3   : > { %v2172_v14 = vunpack.i.h.bf16 %v2170_v11  ;;  %v2171_v16 = vunpack.i.l.bf16 %v2170_v11  ;;  %v2165_v17 = vpop.permute.xlu0 %2164 }
  0xb4   : > { %v2167_v19 = vunpack.i.h.bf16 %v2165_v17  ;;  %v2166_v22 = vunpack.i.l.bf16 %v2165_v17 }
  0xb5   : > { %v747_v26 = vsel %vm390_vm2, %v739_v18, %v2171_v16  ;;  %v748_v27 = vsel %vm390_vm2, %v740_v1, %v2172_v14 }
  0xb6   : > { %v752_v28 = vpack.c.bf16 %v748_v27, %v747_v26  ;;  %v745_v29 = vsel %vm390_vm2, %v737_v25, %v2166_v22  ;;  %v746_v30 = vsel %vm390_vm2, %v738_v24, %v2167_v19  ;;  %v2180_v31 = vpop.permute.xlu1 %2179 }
  0xb7   : > { %v751_v35 = vpack.c.bf16 %v746_v30, %v745_v29  ;;  %v2175_v36 = vpop.permute.xlu0 %2174  ;;  %v2182_v50 = vunpack.i.h.bf16 %v2180_v31  ;;  %v2181_v51 = vunpack.i.l.bf16 %v2180_v31 }
  0xb8   : > { %v2177_v38 = vunpack.i.h.bf16 %v2175_v36  ;;  %v2176_v40 = vunpack.i.l.bf16 %v2175_v36 }
  0xb9   : > { %2017 = vmatprep.mubr.msk.bf16.mxu1 %vm418_vm3, %v751_v35 }
  0xba   : > { %2018 = vmatmul.mubr.msk.bf16.gmra.mrb[4].mxu1 %vm418_vm3, %v752_v28  ;;  %v2190_v37 = vpop.permute.xlu1 %2189  ;;  %v1077_v53 = vsel %vm372_vm0, %v2365_v6, %v2177_v38  ;;  %v1076_v55 = vsel %vm372_vm0, %v2362_v5, %v2176_v40  ;;  %v1079_v6 = vsel %vm372_vm0, %v2437_v34, %v2182_v50  ;;  %v1078_v5 = vsel %vm372_vm0, %v2390_v15, %v2181_v51 }
  0xbb   : > { %v2185_v49 = vpop.permute.xlu0 %2184  ;;  %v2192_v59 = vunpack.i.h.bf16 %v2190_v37  ;;  %v2191_v60 = vunpack.i.l.bf16 %v2190_v37 }
  0xbc   : > { %v2187_v41 = vunpack.i.h.bf16 %v2185_v49  ;;  %v2186_v46 = vunpack.i.l.bf16 %v2185_v49 }
  0xbd   : > { %v1086_v8 = vsel %vm381_vm1, %v1078_v5, %v2191_v60  ;;  %v1087_v48 = vsel %vm381_vm1, %v1079_v6, %v2192_v59 }
  0xbe   : > { %v2200_v47 = vpop.permute.xlu1 %2199  ;;  %v1084_v61 = vsel %vm381_vm1, %v1076_v55, %v2186_v46  ;;  %v1085_v62 = vsel %vm381_vm1, %v1077_v53, %v2187_v41 }
  0xbf   : > { %v2195_v52 = vpop.permute.xlu0 %2194  ;;  %v2202_v9 = vunpack.i.h.bf16 %v2200_v47  ;;  %v2201_v10 = vunpack.i.l.bf16 %v2200_v47 }
  0xc0   : > { %v2197_v57 = vunpack.i.h.bf16 %v2195_v52  ;;  %v2196_v58 = vunpack.i.l.bf16 %v2195_v52 }
  0xc1   : > { %v1427_v22 = vsel %vm372_vm0, %v2409_v21, %v2202_v9  ;;  %v1426_v24 = vsel %vm372_vm0, %v2406_v20, %v2201_v10 }
  0xc2   : > { %v1092_v63 = vsel %vm390_vm2, %v1084_v61, %v2196_v58  ;;  %v1093_v0 = vsel %vm390_vm2, %v1085_v62, %v2197_v57  ;;  %v2210_v2 = vpop.permute.xlu1 %2209 }
  0xc3   : > { %v1100_v3 = vpack.c.bf16 %v1093_v0, %v1092_v63  ;;  %v2205_v4 = vpop.permute.xlu0 %2204  ;;  %v2212_v14 = vunpack.i.h.bf16 %v2210_v2  ;;  %v2211_v34 = vunpack.i.l.bf16 %v2210_v2 }
  0xc4   : > { %v2207_v7 = vunpack.i.h.bf16 %v2205_v4  ;;  %v2206_v23 = vunpack.i.l.bf16 %v2205_v4 }
  0xc5   : > { %2023 = vmatprep.mubr.msk.bf16.mxu0 %vm418_vm3, %v1100_v3  ;;  %v1429_v26 = vsel %vm372_vm0, %v2466_v45, %v2212_v14  ;;  %v1428_v27 = vsel %vm372_vm0, %v2463_v44, %v2211_v34 }
  0xc6   : > { %v1095_v11 = vsel %vm390_vm2, %v1087_v48, %v2207_v7  ;;  %v1094_v12 = vsel %vm390_vm2, %v1086_v8, %v2206_v23  ;;  %v2220_v13 = vpop.permute.xlu1 %2219 }
  0xc7   : > { %v1101_v16 = vpack.c.bf16 %v1095_v11, %v1094_v12  ;;  %v2215_v17 = vpop.permute.xlu0 %2214  ;;  %v2222_v15 = vunpack.i.h.bf16 %v2220_v13  ;;  %v2221_v18 = vunpack.i.l.bf16 %v2220_v13 }
  0xc8   : > { %v2217_v1 = vunpack.i.h.bf16 %v2215_v17  ;;  %v2216_v19 = vunpack.i.l.bf16 %v2215_v17 }
  0xc9   : > { %2024 = vmatmul.mubr.msk.bf16.vlgmr.msra.gmra.mrb[8].mxu0 %vm418_vm3, %v1101_v16  ;;  %v1436_v31 = vsel %vm381_vm1, %v1428_v27, %v2221_v18  ;;  %v1437_v35 = vsel %vm381_vm1, %v1429_v26, %v2222_v15 }
  0xca   : > { %v2230_v25 = vpop.permute.xlu1 %2229  ;;  %v1435_v21 = vsel %vm381_vm1, %v1427_v22, %v2217_v1  ;;  %v1434_v20 = vsel %vm381_vm1, %v1426_v24, %v2216_v19 }
  0xcb   : > { %v2232_v28 = vunpack.i.h.bf16 %v2230_v25  ;;  %v2231_v29 = vunpack.i.l.bf16 %v2230_v25  ;;  %v2225_v30 = vpop.permute.xlu0 %2224 }
  0xcc   : > { %v2227_v36 = vunpack.i.h.bf16 %v2225_v30  ;;  %v2226_v37 = vunpack.i.l.bf16 %v2225_v30 }
  0xcd   : > { %v1444_v49 = vsel %vm390_vm2, %v1436_v31, %v2231_v29  ;;  %v1445_v45 = vsel %vm390_vm2, %v1437_v35, %v2232_v28 }
  0xce   : > { %v1451_v38 = vpack.c.bf16 %v1445_v45, %v1444_v49  ;;  %v1442_v44 = vsel %vm390_vm2, %v1434_v20, %v2226_v37  ;;  %v1443_v40 = vsel %vm390_vm2, %v1435_v21, %v2227_v36  ;;  %v2240_v41 = vpop.permute.xlu1 %2239 }
  0xcf   : > { %v1450_v46 = vpack.c.bf16 %v1443_v40, %v1442_v44  ;;  %v2235_v47 = vpop.permute.xlu0 %2234  ;;  %v2242_v59 = vunpack.i.h.bf16 %v2240_v41  ;;  %v2241_v60 = vunpack.i.l.bf16 %v2240_v41 }
  0xd0   : > { %v2237_v52 = vunpack.i.h.bf16 %v2235_v47  ;;  %v2236_v53 = vunpack.i.l.bf16 %v2235_v47  ;;  %v2687_v47 = vld [vmem:[%s2877_s2] ss:$0 sm:$0xff] }
  0xd1   : > { %2033 = vmatprep.mubr.msk.bf16.mxu1 %vm418_vm3, %v1450_v46 }
  0xd2   : > { %2034 = vmatmul.mubr.msk.bf16.vlgmr.msra.gmra.mrb[8].mxu1 %vm418_vm3, %v1451_v38  ;;  %v2250_v50 = vpop.permute.xlu1 %2249  ;;  %v1081_v62 = vsel %vm372_vm0, %v2434_v33, %v2237_v52  ;;  %v1080_v63 = vsel %vm372_vm0, %v2431_v32, %v2236_v53  ;;  %v1083_v33 = vsel %vm372_vm0, %v2519_v54, %v2242_v59  ;;  %v1082_v32 = vsel %vm372_vm0, %v2450_v39, %v2241_v60  ;;  %v1897_v39 = vld [vmem:[%s2352_s23 + $0x92] sm:$0xff]  ;;  %s241_s23 = scalar_lea.vmem %s2880_s5, %s2882_s19 }
  0xd3   : > { %v2245_v51 = vpop.permute.xlu0 %2244  ;;  %v2252_v3 = vunpack.i.h.bf16 %v2250_v50  ;;  %v2251_v4 = vunpack.i.l.bf16 %v2250_v50 }
  0xd4   : > { %v2247_v55 = vunpack.i.h.bf16 %v2245_v51  ;;  %v2246_v57 = vunpack.i.l.bf16 %v2245_v51 }
  0xd5   : > { %v1090_v12 = vsel %vm381_vm1, %v1082_v32, %v2251_v4  ;;  %v1091_v13 = vsel %vm381_vm1, %v1083_v33, %v2252_v3 }
  0xd6   : > { %v2260_v58 = vpop.permute.xlu1 %2259  ;;  %v1088_v6 = vsel %vm381_vm1, %v1080_v63, %v2246_v57  ;;  %v1089_v5 = vsel %vm381_vm1, %v1081_v62, %v2247_v55 }
  0xd7   : > { %v2255_v61 = vpop.permute.xlu0 %2254  ;;  %v2262_v14 = vunpack.i.h.bf16 %v2260_v58  ;;  %v2261_v34 = vunpack.i.l.bf16 %v2260_v58 }
  0xd8   : > { %v2257_v0 = vunpack.i.h.bf16 %v2255_v61  ;;  %v2256_v2 = vunpack.i.l.bf16 %v2255_v61 }
  0xd9   : > { %v1431_v27 = vsel %vm372_vm0, %v2460_v43, %v2262_v14  ;;  %v1430_v28 = vsel %vm372_vm0, %v2457_v42, %v2261_v34 }
  0xda   : > { %v1096_v7 = vsel %vm390_vm2, %v1088_v6, %v2256_v2  ;;  %v1097_v23 = vsel %vm390_vm2, %v1089_v5, %v2257_v0  ;;  %v2270_v8 = vpop.permute.xlu1 %2269 }
  0xdb   : > { %v1102_v48 = vpack.c.bf16 %v1097_v23, %v1096_v7  ;;  %v2265_v9 = vpop.permute.xlu0 %2264  ;;  %v2272_v54 = vunpack.i.h.bf16 %v2270_v8  ;;  %v2271_v18 = vunpack.i.l.bf16 %v2270_v8 }
  0xdc   : > { %v2267_v10 = vunpack.i.h.bf16 %v2265_v9  ;;  %v2266_v11 = vunpack.i.l.bf16 %v2265_v9 }
  0xdd   : > { %2027 = vmatprep.mubr.msk.bf16.mxu0 %vm418_vm3, %v1102_v48  ;;  %v1433_v30 = vsel %vm372_vm0, %v1897_v39, %v2272_v54  ;;  %v1432_v31 = vsel %vm372_vm0, %v2526_v56, %v2271_v18 }
  0xde   : > { %v1099_v16 = vsel %vm390_vm2, %v1091_v13, %v2267_v10  ;;  %v1098_v17 = vsel %vm390_vm2, %v1090_v12, %v2266_v11  ;;  %v2280_v15 = vpop.permute.xlu1 %2279 }
  0xdf   : > { %v1103_v1 = vpack.c.bf16 %v1099_v16, %v1098_v17  ;;  %v2275_v19 = vpop.permute.xlu0 %2274  ;;  %v2282_v22 = vunpack.i.h.bf16 %v2280_v15  ;;  %v2281_v24 = vunpack.i.l.bf16 %v2280_v15 }
  0xe0   : > { %v2277_v25 = vunpack.i.h.bf16 %v2275_v19  ;;  %v2276_v26 = vunpack.i.l.bf16 %v2275_v19 }
  0xe1   : > { %2028 = vmatmul.mubr.msk.bf16.gmra.mrb[12].mxu0 %vm418_vm3, %v1103_v1  ;;  %v1440_v21 = vsel %vm381_vm1, %v1432_v31, %v2281_v24  ;;  %v1441_v20 = vsel %vm381_vm1, %v1433_v30, %v2282_v22 }
  0xe2   : > { %v2290_v29 = vpop.permute.xlu1 %2289  ;;  %v1439_v43 = vsel %vm381_vm1, %v1431_v27, %v2277_v25  ;;  %v1438_v42 = vsel %vm381_vm1, %v1430_v28, %v2276_v26 }
  0xe3   : > { %v2292_v35 = vunpack.i.h.bf16 %v2290_v29  ;;  %v2291_v36 = vunpack.i.l.bf16 %v2290_v29  ;;  %v2285_v37 = vpop.permute.xlu0 %2284 }
  0xe4   : > { %v2287_v49 = vunpack.i.h.bf16 %v2285_v37  ;;  %v2286_v45 = vunpack.i.l.bf16 %v2285_v37 }
  0xe5   : > { %v1448_v38 = vsel %vm390_vm2, %v1440_v21, %v2291_v36  ;;  %v1449_v44 = vsel %vm390_vm2, %v1441_v20, %v2292_v35 }
  0xe6   : > { %v1453_v40 = vpack.c.bf16 %v1449_v44, %v1448_v38  ;;  %v1446_v56 = vsel %vm390_vm2, %v1438_v42, %v2286_v45  ;;  %v1447_v41 = vsel %vm390_vm2, %v1439_v43, %v2287_v49 }
  0xe7   : > { %v1452_v46 = vpack.c.bf16 %v1447_v41, %v1446_v56 }
  0xe9   : > { %2037 = vmatprep.mubr.msk.bf16.mxu1 %vm418_vm3, %v1452_v46 }
  0xea   : > { %2038 = vmatmul.mubr.msk.bf16.gmra.mrb[12].mxu1 %vm418_vm3, %v1453_v40 }
 0x16c   : > { %v2005_v50 = vpop.f32.mrb[0].mxu0 }
 0x16d   : > { %v474_v51 = vadd.f32 %v2005_v50, %v2687_v47  ;;  %v465_v52 = vpop.f32.mrb[1].mxu0 }
 0x16e   : > { %v466_v53 = vadd.f32 %v2687_v47, %v465_v52  ;;  %v2006_v55 = vpop.f32.mrb[2].mxu0 }
 0x16f   : > { %v498_v57 = vmax.f32 %v474_v51, 0.0  ;;  %v477_v58 = vadd.f32 %v2006_v55, %v2687_v47  ;;  %v468_v59 = vpop.f32.mrb[3].mxu0 }
 0x170   : > { %v496_v60 = vmax.f32 %v466_v53, 0.0  ;;  %v469_v61 = vadd.f32 %v2687_v47, %v468_v59 }
 0x171   : > { %v1951_v62 = vpack.c.bf16 %v498_v57, %v498_v57  ;;  %v499_v63 = vmax.f32 %v477_v58, 0.0  ;;  %v569_v4 = vmul.f32 %v498_v57, %v498_v57  ;;  %v548_v33 = vsel %vm381_vm1, %v498_v57, 0.0 }
 0x172   : > { %v1949_v0 = vpack.c.bf16 %v496_v60, %v496_v60  ;;  %v567_v2 = vmul.f32 %v496_v60, %v496_v60  ;;  %v497_v3 = vmax.f32 %v469_v61, 0.0  ;;  %v545_v5 = vsel %vm381_vm1, %v496_v60, 0.0 }
 0x173   : > { %539 = vst.msk [vmem:[%s2696_s15 + $0x8] sm:$0xf] %vm536_vm4, %v1951_v62  ;;  %v1952_v6 = vpack.c.bf16 %v499_v63, %v499_v63  ;;  %v578_v13 = vsel %vm381_vm1, %v569_v4, 0.0  ;;  %v550_v15 = vsel %vm381_vm1, %v499_v63, 0.0  ;;  %v570_v54 = vmul.f32 %v499_v63, %v499_v63 }
 0x174   : > { %537 = vst.msk [vmem:[%s2696_s15] sm:$0xf] %vm536_vm4, %v1949_v0  ;;  %v1950_v7 = vpack.c.bf16 %v497_v3, %v497_v3  ;;  %v546_v23 = vsel %vm381_vm1, %v497_v3, 0.0  ;;  %v568_v8 = vmul.f32 %v497_v3, %v497_v3  ;;  %v575_v32 = vsel %vm381_vm1, %v567_v2, 0.0 }
 0x175   : > { %540 = vst.msk [vmem:[%s2696_s15 + $0xc] sm:$0xf] %vm536_vm4, %v1952_v6  ;;  %v547_v48 = vadd.f32 %v546_v23, %v545_v5  ;;  %v2015_v9 = vpop.f32.mrb[0].mxu1  ;;  %v580_v31 = vsel %vm381_vm1, %v570_v54, 0.0 }
 0x176   : > { %538 = vst.msk [vmem:[%s2696_s15 + $0x4] sm:$0xf] %vm536_vm4, %v1950_v7  ;;  %v576_v10 = vsel %vm381_vm1, %v568_v8, 0.0  ;;  %v824_v11 = vadd.f32 %v2015_v9, %v2687_v47  ;;  %v815_v12 = vpop.f32.mrb[1].mxu1 }
 0x177   : > { %v549_v14 = vadd.f32 %v548_v33, %v547_v48  ;;  %v577_v34 = vadd.f32 %v576_v10, %v575_v32  ;;  %v816_v16 = vadd.f32 %v2687_v47, %v815_v12  ;;  %v2016_v17 = vpop.f32.mrb[2].mxu1 }
 0x178   : > { %v848_v18 = vmax.f32 %v824_v11, 0.0  ;;  %v827_v1 = vadd.f32 %v2016_v17, %v2687_v47  ;;  %v818_v19 = vpop.f32.mrb[3].mxu1 }
 0x179   : > { %v579_v39 = vadd.f32 %v578_v13, %v577_v34  ;;  %v846_v22 = vmax.f32 %v816_v16, 0.0  ;;  %v819_v24 = vadd.f32 %v2687_v47, %v818_v19  ;;  %v551_v25 = vadd.f32 %v550_v15, %v549_v14 }
 0x17a   : > { %v1959_v26 = vpack.c.bf16 %v848_v18, %v848_v18  ;;  %v849_v27 = vmax.f32 %v827_v1, 0.0  ;;  %v919_v35 = vmul.f32 %v848_v18, %v848_v18  ;;  %v898_v42 = vsel %vm381_vm1, %v848_v18, 0.0 }
 0x17b   : > { %v1957_v28 = vpack.c.bf16 %v846_v22, %v846_v22  ;;  %v917_v29 = vmul.f32 %v846_v22, %v846_v22  ;;  %v847_v30 = vmax.f32 %v819_v24, 0.0  ;;  %v895_v37 = vsel %vm381_vm1, %v846_v22, 0.0 }
 0x17c   : > { %1828 = vst.msk [vmem:[%s2696_s15 + $0x28] sm:$0xf] %vm536_vm4, %v1959_v26  ;;  %v1960_v36 = vpack.c.bf16 %v849_v27, %v849_v27  ;;  %v581_v43 = vadd.f32 %v580_v31, %v579_v39  ;;  %v920_v44 = vmul.f32 %v849_v27, %v849_v27  ;;  %v928_v46 = vsel %vm381_vm1, %v919_v35, 0.0 }
 0x17d   : > { %1826 = vst.msk [vmem:[%s2696_s15 + $0x20] sm:$0xf] %vm536_vm4, %v1957_v28  ;;  %v1958_v21 = vpack.c.bf16 %v847_v30, %v847_v30  ;;  %v896_v20 = vsel %vm381_vm1, %v847_v30, 0.0  ;;  %v918_v49 = vmul.f32 %v847_v30, %v847_v30  ;;  %v925_v38 = vsel %vm381_vm1, %v917_v29, 0.0 }
 0x17e   : > { %1829 = vst.msk [vmem:[%s2696_s15 + $0x2c] sm:$0xf] %vm536_vm4, %v1960_v36  ;;  %v897_v45 = vadd.f32 %v896_v20, %v895_v37  ;;  %v900_v50 = vsel %vm381_vm1, %v849_v27, 0.0  ;;  %v930_v53 = vsel %vm381_vm1, %v920_v44, 0.0 }
 0x17f   : > { %1827 = vst.msk [vmem:[%s2696_s15 + $0x24] sm:$0xf] %vm536_vm4, %v1958_v21  ;;  %v926_v40 = vsel %vm381_vm1, %v918_v49, 0.0 }
 0x180   : > { %v899_v56 = vadd.f32 %v898_v42, %v897_v45  ;;  %v927_v41 = vadd.f32 %v926_v40, %v925_v38 }
 0x182   : > { %v929_v51 = vadd.f32 %v928_v46, %v927_v41  ;;  %v901_v52 = vadd.f32 %v900_v50, %v899_v56 }
 0x184   : > { %v2009_v55 = vpop.f32.mrb[4].mxu0  ;;  %v2735_v57 = vadd.f32 %v930_v53, %v929_v51 }
 0x185   : > { %v490_v58 = vadd.f32 %v2009_v55, %v2687_v47  ;;  %v481_v59 = vpop.f32.mrb[5].mxu0 }
 0x186   : > { %v482_v60 = vadd.f32 %v2687_v47, %v481_v59  ;;  %v2010_v61 = vpop.f32.mrb[6].mxu0 }
 0x187   : > { %v502_v62 = vmax.f32 %v490_v58, 0.0  ;;  %v493_v63 = vadd.f32 %v2010_v61, %v2687_v47  ;;  %v484_v0 = vpop.f32.mrb[7].mxu0 }
 0x188   : > { %v500_v2 = vmax.f32 %v482_v60, 0.0  ;;  %v485_v3 = vadd.f32 %v2687_v47, %v484_v0 }
 0x189   : > { %v1955_v4 = vpack.c.bf16 %v502_v62, %v502_v62  ;;  %v503_v6 = vmax.f32 %v493_v63, 0.0  ;;  %v573_v11 = vmul.f32 %v502_v62, %v502_v62  ;;  %v556_v16 = vsel %vm381_vm1, %v502_v62, 0.0 }
 0x18a   : > { %v1953_v5 = vpack.c.bf16 %v500_v2, %v500_v2  ;;  %v552_v7 = vsel %vm381_vm1, %v500_v2, 0.0  ;;  %v571_v23 = vmul.f32 %v500_v2, %v500_v2  ;;  %v501_v8 = vmax.f32 %v485_v3, 0.0 }
 0x18b   : > { %543 = vst.msk [vmem:[%s2696_s15 + $0x18] sm:$0xf] %vm536_vm4, %v1955_v4  ;;  %v553_v48 = vadd.f32 %v552_v7, %v551_v25  ;;  %v1956_v9 = vpack.c.bf16 %v503_v6, %v503_v6  ;;  %v574_v17 = vmul.f32 %v503_v6, %v503_v6  ;;  %v558_v22 = vsel %vm381_vm1, %v503_v6, 0.0 }
 0x18c   : > { %541 = vst.msk [vmem:[%s2696_s15 + $0x10] sm:$0xf] %vm536_vm4, %v1953_v5  ;;  %v582_v33 = vsel %vm381_vm1, %v571_v23, 0.0  ;;  %v1954_v32 = vpack.c.bf16 %v501_v8, %v501_v8  ;;  %v554_v10 = vsel %vm381_vm1, %v501_v8, 0.0  ;;  %v572_v14 = vmul.f32 %v501_v8, %v501_v8 }
 0x18d   : > { %v583_v12 = vadd.f32 %v582_v33, %v581_v43  ;;  %544 = vst.msk [vmem:[%s2696_s15 + $0x1c] sm:$0xf] %vm536_vm4, %v1956_v9  ;;  %v555_v13 = vadd.f32 %v554_v10, %v553_v48  ;;  %v2019_v34 = vpop.f32.mrb[4].mxu1  ;;  %v586_v28 = vsel %vm381_vm1, %v573_v11, 0.0  ;;  %v588_v35 = vsel %vm381_vm1, %v574_v17, 0.0 }
 0x18e   : > { %542 = vst.msk [vmem:[%s2696_s15 + $0x14] sm:$0xf] %vm536_vm4, %v1954_v32  ;;  %v840_v15 = vadd.f32 %v2019_v34, %v2687_v47  ;;  %v831_v54 = vpop.f32.mrb[5].mxu1  ;;  %v584_v1 = vsel %vm381_vm1, %v572_v14, 0.0 }
 0x18f   : > { %v557_v18 = vadd.f32 %v556_v16, %v555_v13  ;;  %v832_v19 = vadd.f32 %v2687_v47, %v831_v54  ;;  %v2020_v39 = vpop.f32.mrb[6].mxu1  ;;  %v585_v24 = vadd.f32 %v584_v1, %v583_v12 }
 0x190   : > { %v852_v25 = vmax.f32 %v840_v15, 0.0  ;;  %v843_v26 = vadd.f32 %v2020_v39, %v2687_v47  ;;  %v834_v27 = vpop.f32.mrb[7].mxu1 }
 0x191   : > { %v559_v29 = vadd.f32 %v558_v22, %v557_v18  ;;  %v850_v30 = vmax.f32 %v832_v19, 0.0  ;;  %v835_v31 = vadd.f32 %v2687_v47, %v834_v27  ;;  %v587_v36 = vadd.f32 %v586_v28, %v585_v24 }
 0x192   : > { %v1963_v37 = vpack.c.bf16 %v852_v25, %v852_v25  ;;  %v853_v38 = vmax.f32 %v843_v26, 0.0  ;;  %v923_v59 = vmul.f32 %v852_v25, %v852_v25  ;;  %v906_v61 = vsel %vm381_vm1, %v852_v25, 0.0 }
 0x193   : > { %v560_v21 = vrot.slane %v559_v29, 4  ;;  %v1961_v20 = vpack.c.bf16 %v850_v30, %v850_v30  ;;  %v902_v49 = vsel %vm381_vm1, %v850_v30, 0.0  ;;  %v921_v45 = vmul.f32 %v850_v30, %v850_v30 }
 0x194   : > { %v589_v43 = vadd.f32 %v588_v35, %v587_v36  ;;  %1832 = vst.msk [vmem:[%s2696_s15 + $0x38] sm:$0xf] %vm536_vm4, %v1963_v37  ;;  %v903_v42 = vadd.f32 %v902_v49, %v901_v52  ;;  %v851_v56 = vmax.f32 %v835_v31, 0.0  ;;  %v1964_v50 = vpack.c.bf16 %v853_v38, %v853_v38 }
 0x195   : > { %v561_v44 = vadd.f32 %v560_v21, %v559_v29  ;;  %1830 = vst.msk [vmem:[%s2696_s15 + $0x30] sm:$0xf] %vm536_vm4, %v1961_v20  ;;  %v932_v40 = vsel %vm381_vm1, %v921_v45, 0.0  ;;  %v924_v62 = vmul.f32 %v853_v38, %v853_v38  ;;  %v908_v2 = vsel %vm381_vm1, %v853_v38, 0.0 }
 0x196   : > { %v590_v41 = vrot.slane %v589_v43, 4  ;;  %v933_v46 = vadd.f32 %v932_v40, %v2735_v57  ;;  %v1962_v53 = vpack.c.bf16 %v851_v56, %v851_v56  ;;  %v904_v55 = vsel %vm381_vm1, %v851_v56, 0.0  ;;  %1833 = vst.msk [vmem:[%s2696_s15 + $0x3c] sm:$0xf] %vm536_vm4, %v1964_v50 }
 0x197   : > { %v562_v51 = vrot.slane %v561_v44, 2  ;;  %v905_v52 = vadd.f32 %v904_v55, %v903_v42  ;;  %v922_v60 = vmul.f32 %v851_v56, %v851_v56  ;;  %v936_v6 = vsel %vm381_vm1, %v923_v59, 0.0 }
 0x198   : > { %v591_v58 = vadd.f32 %v590_v41, %v589_v43  ;;  %1831 = vst.msk [vmem:[%s2696_s15 + $0x34] sm:$0xf] %vm536_vm4, %v1962_v53  ;;  %v938_v9 = vsel %vm381_vm1, %v924_v62, 0.0 }
 0x199   : > { %v907_v63 = vadd.f32 %v906_v61, %v905_v52  ;;  %v934_v0 = vsel %vm381_vm1, %v922_v60, 0.0  ;;  %v563_v57 = vadd.f32 %v562_v51, %v561_v44 }
 0x19a   : > { %v935_v3 = vadd.f32 %v934_v0, %v933_v46  ;;  %v592_v4 = vrot.slane %v591_v58, 2 }
 0x19b   : > { %v909_v5 = vadd.f32 %v908_v2, %v907_v63  ;;  %v564_v11 = vrot.slane %v563_v57, 1 }
 0x19c   : > { %v2025_v7 = vpop.f32.mrb[8].mxu0  ;;  %v937_v23 = vadd.f32 %v936_v6, %v935_v3  ;;  %v593_v16 = vadd.f32 %v592_v4, %v591_v58 }
 0x19d   : > { %v1175_v8 = vadd.f32 %v2025_v7, %v2687_v47  ;;  %v1166_v48 = vpop.f32.mrb[9].mxu0  ;;  %v910_v33 = vrot.slane %v909_v5, 4  ;;  %v565_v25 = vadd.f32 %v564_v11, %v563_v57 }
 0x19e   : > { %v1167_v32 = vadd.f32 %v2687_v47, %v1166_v48  ;;  %v2026_v10 = vpop.f32.mrb[10].mxu0  ;;  %v939_v12 = vadd.f32 %v938_v9, %v937_v23  ;;  %v594_v29 = vrot.slane %v593_v16, 1 }
 0x19f   : > { %v1199_v13 = vmax.f32 %v1175_v8, 0.0  ;;  %v1178_v14 = vadd.f32 %v2026_v10, %v2687_v47  ;;  %v1169_v34 = vpop.f32.mrb[11].mxu0  ;;  %v911_v17 = vadd.f32 %v910_v33, %v909_v5 }
 0x1a0   : > { %v1197_v15 = vmax.f32 %v1167_v32, 0.0  ;;  %v1170_v54 = vadd.f32 %v2687_v47, %v1169_v34  ;;  %v940_v18 = vrot.slane %v939_v12, 4  ;;  %v595_v3 = vadd.f32 %v594_v29, %v593_v16 }
 0x1a1   : > { %v1967_v1 = vpack.c.bf16 %v1199_v13, %v1199_v13  ;;  %v1270_v19 = vmul.f32 %v1199_v13, %v1199_v13  ;;  %v912_v39 = vrot.slane %v911_v17, 2  ;;  %v1200_v27 = vmax.f32 %v1178_v14, 0.0 }
 0x1a2   : > { %v1965_v22 = vpack.c.bf16 %v1197_v15, %v1197_v15  ;;  %v1268_v24 = vmul.f32 %v1197_v15, %v1197_v15  ;;  %v941_v26 = vadd.f32 %v940_v18, %v939_v12  ;;  %v1198_v28 = vmax.f32 %v1170_v54, 0.0 }
 0x1a3   : > { %1884 = vst.msk [vmem:[%s2696_s15 + $0x48] sm:$0xf] %vm536_vm4, %v1967_v1  ;;  %v913_v30 = vadd.f32 %v912_v39, %v911_v17  ;;  %v1249_v31 = vsel %vm381_vm1, %v1199_v13, 0.0  ;;  %v1246_v35 = vsel %vm381_vm1, %v1197_v15, 0.0  ;;  %v1279_v37 = vsel %vm381_vm1, %v1270_v19, 0.0 }
 0x1a4   : > { %1882 = vst.msk [vmem:[%s2696_s15 + $0x40] sm:$0xf] %vm536_vm4, %v1965_v22  ;;  %v942_v36 = vrot.slane %v941_v26, 2  ;;  %v1276_v21 = vsel %vm381_vm1, %v1268_v24, 0.0  ;;  %v1968_v20 = vpack.c.bf16 %v1200_v27, %v1200_v27  ;;  %v1966_v43 = vpack.c.bf16 %v1198_v28, %v1198_v28 }
 0x1a5   : > { %v2035_v49 = vpop.f32.mrb[8].mxu1  ;;  %v914_v45 = vrot.slane %v913_v30, 1  ;;  %v1247_v42 = vsel %vm381_vm1, %v1198_v28, 0.0  ;;  %v1269_v38 = vmul.f32 %v1198_v28, %v1198_v28  ;;  %v1271_v56 = vmul.f32 %v1200_v27, %v1200_v27 }
 0x1a6   : > { %v1516_v44 = vpop.f32.mrb[9].mxu1  ;;  %v943_v40 = vadd.f32 %v942_v36, %v941_v26  ;;  %1885 = vst.msk [vmem:[%s2696_s15 + $0x4c] sm:$0xf] %vm536_vm4, %v1968_v20  ;;  %v1248_v41 = vadd.f32 %v1247_v42, %v1246_v35  ;;  %v1525_v46 = vadd.f32 %v2035_v49, %v2687_v47  ;;  %1883 = vst.msk [vmem:[%s2696_s15 + $0x44] sm:$0xf] %vm536_vm4, %v1966_v43  ;;  %v1251_v8 = vsel %vm381_vm1, %v1200_v27, 0.0 }
 0x1a7   : > { %v2036_v50 = vpop.f32.mrb[10].mxu1  ;;  %v915_v51 = vadd.f32 %v914_v45, %v913_v30  ;;  %v1277_v53 = vsel %vm381_vm1, %v1269_v38, 0.0  ;;  %v1517_v55 = vadd.f32 %v2687_v47, %v1516_v44  ;;  %v1281_v9 = vsel %vm381_vm1, %v1271_v56, 0.0 }
 0x1a8   : > { %v1528_v58 = vadd.f32 %v2036_v50, %v2687_v47  ;;  %v1519_v59 = vpop.f32.mrb[11].mxu1  ;;  %v944_v52 = vrot.slane %v943_v40, 1  ;;  %v1250_v60 = vadd.f32 %v1249_v31, %v1248_v41  ;;  %v1278_v61 = vadd.f32 %v1277_v53, %v1276_v21 }
 0x1a9   : > { %v1549_v62 = vmax.f32 %v1525_v46, 0.0  ;;  %v2799_v63 = vadd.f32 %v915_v51, %v565_v25  ;;  %v1547_v0 = vmax.f32 %v1517_v55, 0.0  ;;  %v1520_v2 = vadd.f32 %v2687_v47, %v1519_v59 }
 0x1aa   : > { %v1550_v57 = vmax.f32 %v1528_v58, 0.0  ;;  %v945_v4 = vadd.f32 %v944_v52, %v943_v40  ;;  %v1280_v6 = vadd.f32 %v1279_v37, %v1278_v61  ;;  %v1252_v10 = vadd.f32 %v1251_v8, %v1250_v60 }
 0x1ab   : > { %v1975_v5 = vpack.c.bf16 %v1549_v62, %v1549_v62  ;;  %v1973_v7 = vpack.c.bf16 %v1547_v0, %v1547_v0  ;;  %v1618_v33 = vmul.f32 %v1547_v0, %v1547_v0  ;;  %v1548_v32 = vmax.f32 %v1520_v2, 0.0 }
 0x1ac   : > { %v2802_v23 = vadd.f32 %v945_v4, %v595_v3  ;;  %v1976_v48 = vpack.c.bf16 %v1550_v57, %v1550_v57  ;;  %v1620_v11 = vmul.f32 %v1549_v62, %v1549_v62  ;;  %v1282_v12 = vadd.f32 %v1281_v9, %v1280_v6 }
 0x1ad   : > { %1940 = vst.msk [vmem:[%s2696_s15 + $0x68] sm:$0xf] %vm536_vm4, %v1975_v5  ;;  %1938 = vst.msk [vmem:[%s2696_s15 + $0x60] sm:$0xf] %vm536_vm4, %v1973_v7  ;;  %v1596_v13 = vsel %vm381_vm1, %v1547_v0, 0.0  ;;  %v1974_v14 = vpack.c.bf16 %v1548_v32, %v1548_v32  ;;  %v1597_v34 = vsel %vm381_vm1, %v1548_v32, 0.0  ;;  %v1619_v16 = vmul.f32 %v1548_v32, %v1548_v32 }
 0x1ae   : > { %1941 = vst.msk [vmem:[%s2696_s15 + $0x6c] sm:$0xf] %vm536_vm4, %v1976_v48  ;;  %v1598_v17 = vadd.f32 %v1597_v34, %v1596_v13  ;;  %v1599_v15 = vsel %vm381_vm1, %v1549_v62, 0.0  ;;  %v1626_v54 = vsel %vm381_vm1, %v1618_v33, 0.0  ;;  %v1621_v18 = vmul.f32 %v1550_v57, %v1550_v57 }
 0x1af   : > { %1939 = vst.msk [vmem:[%s2696_s15 + $0x64] sm:$0xf] %vm536_vm4, %v1974_v14  ;;  %v1627_v1 = vsel %vm381_vm1, %v1619_v16, 0.0  ;;  %v1629_v22 = vsel %vm381_vm1, %v1620_v11, 0.0  ;;  %v1601_v24 = vsel %vm381_vm1, %v1550_v57, 0.0 }
 0x1b0   : > { %v1600_v19 = vadd.f32 %v1599_v15, %v1598_v17  ;;  %v1628_v39 = vadd.f32 %v1627_v1, %v1626_v54  ;;  %v1631_v30 = vsel %vm381_vm1, %v1621_v18, 0.0 }
 0x1b2   : > { %v1630_v26 = vadd.f32 %v1629_v22, %v1628_v39  ;;  %v1602_v29 = vadd.f32 %v1601_v24, %v1600_v19 }
 0x1b4   : > { %v2029_v25 = vpop.f32.mrb[12].mxu0  ;;  %v1632_v20 = vadd.f32 %v1631_v30, %v1630_v26 }
 0x1b5   : > { %v1191_v27 = vadd.f32 %v2029_v25, %v2687_v47  ;;  %v1182_v28 = vpop.f32.mrb[13].mxu0 }
 0x1b6   : > { %v1183_v31 = vadd.f32 %v2687_v47, %v1182_v28  ;;  %v2030_v35 = vpop.f32.mrb[14].mxu0 }
 0x1b7   : > { %v1203_v36 = vmax.f32 %v1191_v27, 0.0  ;;  %v1194_v37 = vadd.f32 %v2030_v35, %v2687_v47  ;;  %v1185_v21 = vpop.f32.mrb[15].mxu0 }
 0x1b8   : > { %v1201_v49 = vmax.f32 %v1183_v31, 0.0  ;;  %v1186_v45 = vadd.f32 %v2687_v47, %v1185_v21 }
 0x1b9   : > { %v1971_v43 = vpack.c.bf16 %v1203_v36, %v1203_v36  ;;  %v1204_v42 = vmax.f32 %v1194_v37, 0.0  ;;  %v1274_v55 = vmul.f32 %v1203_v36, %v1203_v36  ;;  %v1257_v61 = vsel %vm381_vm1, %v1203_v36, 0.0 }
 0x1ba   : > { %v1969_v38 = vpack.c.bf16 %v1201_v49, %v1201_v49  ;;  %v1253_v44 = vsel %vm381_vm1, %v1201_v49, 0.0  ;;  %v1272_v40 = vmul.f32 %v1201_v49, %v1201_v49  ;;  %v1202_v56 = vmax.f32 %v1186_v45, 0.0 }
 0x1bb   : > { %1888 = vst.msk [vmem:[%s2696_s15 + $0x58] sm:$0xf] %vm536_vm4, %v1971_v43  ;;  %v1254_v41 = vadd.f32 %v1253_v44, %v1252_v10  ;;  %v1972_v46 = vpack.c.bf16 %v1204_v42, %v1204_v42  ;;  %v1275_v62 = vmul.f32 %v1204_v42, %v1204_v42  ;;  %v1259_v5 = vsel %vm381_vm1, %v1204_v42, 0.0 }
 0x1bc   : > { %1886 = vst.msk [vmem:[%s2696_s15 + $0x50] sm:$0xf] %vm536_vm4, %v1969_v38  ;;  %v1283_v50 = vsel %vm381_vm1, %v1272_v40, 0.0  ;;  %v1970_v51 = vpack.c.bf16 %v1202_v56, %v1202_v56  ;;  %v1255_v53 = vsel %vm381_vm1, %v1202_v56, 0.0  ;;  %v1273_v52 = vmul.f32 %v1202_v56, %v1202_v56 }
 0x1bd   : > { %v1284_v58 = vadd.f32 %v1283_v50, %v1282_v12  ;;  %1889 = vst.msk [vmem:[%s2696_s15 + $0x5c] sm:$0xf] %vm536_vm4, %v1972_v46  ;;  %v1256_v59 = vadd.f32 %v1255_v53, %v1254_v41  ;;  %v2039_v60 = vpop.f32.mrb[12].mxu1  ;;  %v1287_v33 = vsel %vm381_vm1, %v1274_v55, 0.0  ;;  %v1289_v12 = vsel %vm381_vm1, %v1275_v62, 0.0 }
 0x1be   : > { %1887 = vst.msk [vmem:[%s2696_s15 + $0x54] sm:$0xf] %vm536_vm4, %v1970_v51  ;;  %v1541_v0 = vadd.f32 %v2039_v60, %v2687_v47  ;;  %v1532_v57 = vpop.f32.mrb[13].mxu1  ;;  %v1285_v3 = vsel %vm381_vm1, %v1273_v52, 0.0 }
 0x1bf   : > { %v1258_v2 = vadd.f32 %v1257_v61, %v1256_v59  ;;  %v1533_v4 = vadd.f32 %v2687_v47, %v1532_v57  ;;  %v2040_v6 = vpop.f32.mrb[14].mxu1  ;;  %v1286_v7 = vadd.f32 %v1285_v3, %v1284_v58 }
 0x1c0   : > { %v1553_v8 = vmax.f32 %v1541_v0, 0.0  ;;  %v1544_v48 = vadd.f32 %v2040_v6, %v2687_v47  ;;  %v1535_v9 = vpop.f32.mrb[15].mxu1 }
 0x1c1   : > { %v1260_v32 = vadd.f32 %v1259_v5, %v1258_v2  ;;  %v1551_v10 = vmax.f32 %v1533_v4, 0.0  ;;  %v1536_v11 = vadd.f32 %v2687_v47, %v1535_v9  ;;  %v1288_v13 = vadd.f32 %v1287_v33, %v1286_v7 }
 0x1c2   : > { %v1979_v14 = vpack.c.bf16 %v1553_v8, %v1553_v8  ;;  %v1554_v1 = vmax.f32 %v1544_v48, 0.0  ;;  %v1624_v31 = vmul.f32 %v1553_v8, %v1553_v8  ;;  %v1607_v37 = vsel %vm381_vm1, %v1553_v8, 0.0 }
 0x1c3   : > { %v1261_v34 = vrot.slane %v1260_v32, 4  ;;  %v1977_v16 = vpack.c.bf16 %v1551_v10, %v1551_v10  ;;  %v1603_v17 = vsel %vm381_vm1, %v1551_v10, 0.0  ;;  %v1622_v15 = vmul.f32 %v1551_v10, %v1551_v10 }
 0x1c4   : > { %v1290_v54 = vadd.f32 %v1289_v12, %v1288_v13  ;;  %1944 = vst.msk [vmem:[%s2696_s15 + $0x78] sm:$0xf] %vm536_vm4, %v1979_v14  ;;  %v1604_v18 = vadd.f32 %v1603_v17, %v1602_v29  ;;  %v1552_v39 = vmax.f32 %v1536_v11, 0.0  ;;  %v1980_v25 = vpack.c.bf16 %v1554_v1, %v1554_v1 }
 0x1c5   : > { %v1262_v19 = vadd.f32 %v1261_v34, %v1260_v32  ;;  %1942 = vst.msk [vmem:[%s2696_s15 + $0x70] sm:$0xf] %vm536_vm4, %v1977_v16  ;;  %v1633_v47 = vsel %vm381_vm1, %v1622_v15, 0.0  ;;  %v1625_v49 = vmul.f32 %v1554_v1, %v1554_v1  ;;  %v1609_v42 = vsel %vm381_vm1, %v1554_v1, 0.0 }
 0x1c6   : > { %v1291_v22 = vrot.slane %v1290_v54, 4  ;;  %v1634_v24 = vadd.f32 %v1633_v47, %v1632_v20  ;;  %v1978_v27 = vpack.c.bf16 %v1552_v39, %v1552_v39  ;;  %v1605_v28 = vsel %vm381_vm1, %v1552_v39, 0.0  ;;  %1945 = vst.msk [vmem:[%s2696_s15 + $0x7c] sm:$0xf] %vm536_vm4, %v1980_v25 }
 0x1c7   : > { %v1263_v26 = vrot.slane %v1262_v19, 2  ;;  %v1606_v29 = vadd.f32 %v1605_v28, %v1604_v18  ;;  %v1623_v35 = vmul.f32 %v1552_v39, %v1552_v39  ;;  %v1637_v40 = vsel %vm381_vm1, %v1624_v31, 0.0 }
 0x1c8   : > { %v1292_v30 = vadd.f32 %v1291_v22, %v1290_v54  ;;  %1943 = vst.msk [vmem:[%s2696_s15 + $0x74] sm:$0xf] %vm536_vm4, %v1978_v27  ;;  %v1639_v51 = vsel %vm381_vm1, %v1625_v49, 0.0 }
 0x1c9   : > { %v1264_v36 = vadd.f32 %v1263_v26, %v1262_v19  ;;  %v1608_v45 = vadd.f32 %v1607_v37, %v1606_v29  ;;  %v1635_v20 = vsel %vm381_vm1, %v1623_v35, 0.0 }
 0x1ca   : > { %v1293_v21 = vrot.slane %v1292_v30, 2  ;;  %v1636_v38 = vadd.f32 %v1635_v20, %v1634_v24 }
 0x1cb   : > { %v1265_v43 = vrot.slane %v1264_v36, 1  ;;  %v1610_v56 = vadd.f32 %v1609_v42, %v1608_v45 }
 0x1cc   : > { %v1294_v44 = vadd.f32 %v1293_v21, %v1292_v30  ;;  %v1638_v46 = vadd.f32 %v1637_v40, %v1636_v38 }
 0x1cd   : > { %v1266_v41 = vadd.f32 %v1265_v43, %v1264_v36  ;;  %v1611_v53 = vrot.slane %v1610_v56, 4 }
 0x1ce   : > { %v1295_v50 = vrot.slane %v1294_v44, 1  ;;  %v1640_v58 = vadd.f32 %v1639_v51, %v1638_v46 }
 0x1cf   : > { %v1267_v55 = vadd.f32 %v1266_v41, %v2799_v63  ;;  %v1612_v52 = vadd.f32 %v1611_v53, %v1610_v56 }
 0x1d0   : > { %v1296_v59 = vadd.f32 %v1295_v50, %v1294_v44  ;;  %v1641_v60 = vrot.slane %v1640_v58, 4 }
 0x1d1   : > { %v1613_v62 = vrot.slane %v1612_v52, 2 }
 0x1d2   : > { %v1297_v61 = vadd.f32 %v1296_v59, %v2802_v23  ;;  %v1642_v0 = vadd.f32 %v1641_v60, %v1640_v58 }
 0x1d3   : > { %v1614_v57 = vadd.f32 %v1613_v62, %v1612_v52 }
 0x1d4   : > { %v1643_v2 = vrot.slane %v1642_v0, 2 }
 0x1d5   : > { %v1615_v3 = vrot.slane %v1614_v57, 1 }
 0x1d6   : > { %v1644_v4 = vadd.f32 %v1643_v2, %v1642_v0 }
 0x1d7   : > { %v1616_v6 = vadd.f32 %v1615_v3, %v1614_v57 }
 0x1d8   : > { %v1645_v5 = vrot.slane %v1644_v4, 1 }
 0x1d9   : > { %v1617_v63 = vadd.f32 %v1616_v6, %v1267_v55 }
 0x1da   : > { %v1646_v7 = vadd.f32 %v1645_v5, %v1644_v4 }
 0x1db   : > { %1649 = vst.msk [vmem:[%s238_s20] sm:$0x1] %vm1648_vm5, %v1617_v63 }
 0x1dc   : > { %v1647_v23 = vadd.f32 %v1646_v7, %v1297_v61 }
 0x1de   : > { %1650 = vst.msk [vmem:[%s241_s23] sm:$0x1] %vm1648_vm5, %v1647_v23 }
 0x1df PF: > { %s16_s18 = sadd.s32 1, %s2303_s18  }
 0x1e0   : > { %p13_p4 = scmp.ge.s32.totalorder %s16_s18, 4  }
 0x1e2   :  { %15 = sbr.rel (!%p13_p4) target bundleno = 1 (0x1), region = 94 }

</bundles_post_ra>
